<compile_context>
chip_gen: v7x
topology: tpu7x:2x2x1
jax: 0.10.0
libtpu: 0.0.40
codegen_flags: <defaults>
</compile_context>

<pallas_src>
import math

import jax
import jax.numpy as jnp
from jax import lax
from jax.experimental import pallas as pl
from jax.experimental.pallas import tpu as pltpu


def _attention_kernel(q_ref, k_ref, v_ref,
                      wq_hbm, wk_hbm, w1_hbm, w2_hbm,
                      bq_ref, bk_ref, b1_ref, b2_ref,
                      o_ref,
                      w_vmem, w_sem, k_proj):
    # grid = (B, S // TQ); batch dim is Squeezed out of the activation refs.
    #   q_ref  : (TQ, H) bf16   query tile (1/sqrt(H) already folded into wq/bq)
    #   k_ref  : (S,  H) bf16   full key rows of this batch
    #   v_ref  : (S,  H) f32    full value rows of this batch (f32 for the residual)
    #   w*_hbm : (H,  H) bf16   raw HBM refs, staged once per batch into w_vmem
    #   b*_ref : (1,  H) f32
    #   w_vmem : (4, H, H) bf16 persistent single-buffered weight scratch [wq, wk, w1, w2]
    #   k_proj : (S,  H) bf16   persistent projected-K scratch, reused across TQ tiles
    f32 = jnp.float32
    bf16 = jnp.bfloat16
    tq_idx = pl.program_id(1)
    TQ = q_ref.shape[0]

    @pl.when(tq_idx == 0)
    def _stage_per_batch():
        # Single-buffered weight staging: issue all four DMAs, then wait.
        cps = [pltpu.make_async_copy(src, w_vmem.at[i], w_sem.at[i])
               for i, src in enumerate((wq_hbm, wk_hbm, w1_hbm, w2_hbm))]
        for cp in cps:
            cp.start()
        for cp in cps:
            cp.wait()
        # Project K once per batch: K = key @ wk + bk (bf16 operands, f32 accumulation).
        k_f32 = jnp.dot(k_ref[...], w_vmem[1], preferred_element_type=f32) + bk_ref[...]
        k_proj[...] = k_f32.astype(bf16)

    # Q projection for this tile (scale already folded into wq/bq by the wrapper).
    Q = (jnp.dot(q_ref[...], w_vmem[0], preferred_element_type=f32)
         + bq_ref[...]).astype(bf16)                              # (TQ, H)

    # scores = (Q / sqrt(H)) @ K^T : contract last dims directly (MXU handles the
    # transposed-RHS form; no explicit XLU transpose of K).
    scores = lax.dot_general(Q, k_proj[...],
                             (((1,), (1,)), ((), ())),
                             preferred_element_type=f32)          # (TQ, S)

    # Softmax along S: f32 on the VPU, denominator reciprocal on the EUP (approx;
    # rows sum to ~1 +/- 2^-12, well within the stated tolerance).
    m = jnp.max(scores, axis=-1, keepdims=True)
    e = jnp.exp(scores - m)
    inv = pl.reciprocal(jnp.sum(e, axis=-1, keepdims=True), approx=True)
    attn = (e * inv).astype(bf16)                                 # (TQ, S) bf16

    # weighted = attn @ V + value[tile rows]   (value_layer is unused in the torch forward).
    start = pl.multiple_of(tq_idx * TQ, TQ)
    v_tile = v_ref[pl.ds(start, TQ), :]                           # (TQ, H) f32 residual rows
    weighted = jnp.dot(attn, v_ref[...].astype(bf16),
                       preferred_element_type=f32) + v_tile       # (TQ, H) f32

    # output_layer(weighted) + weighted, where output_layer = Linear -> ReLU -> Linear.
    h1 = jnp.maximum(
        jnp.dot(weighted.astype(bf16), w_vmem[2], preferred_element_type=f32) + b1_ref[...],
        0.0)
    out = (jnp.dot(h1.astype(bf16), w_vmem[3], preferred_element_type=f32)
           + b2_ref[...] + weighted)

    o_ref[...] = out.astype(o_ref.dtype)


def attention_pallas(query, key, value, params, *, tq=None):
    """query/key/value: (B, S, H) float32. params: (in,out) weights and (1,H) biases."""
    B, S, H = query.shape
    f32 = jnp.float32
    bf16 = jnp.bfloat16

    # Suggested TQ: 512 on v5e/v6e, 256 on v7x (64 MiB VMEM). Must divide S and be lane/sublane friendly.
    if tq is None:
        tq = min(S, 256)
    assert S % tq == 0 and tq % 8 == 0 and H % 128 == 0

    # Fold the 1/sqrt(hidden) softmax scale into the query projection (zero in-kernel work).
    scale = 1.0 / math.sqrt(H)
    wq = (params["wq"] * scale).astype(bf16)
    bq = (params["bq"] * scale).astype(f32)
    wk = params["wk"].astype(bf16)
    w1 = params["w1"].astype(bf16)
    w2 = params["w2"].astype(bf16)

    # q/k are only ever MXU operands -> ship bf16 (half the HBM->VMEM traffic).
    # value stays f32 because it also feeds the f32 residual adds.
    q_bf = query.astype(bf16)
    k_bf = key.astype(bf16)

    grid = (B, S // tq)

    q_spec = pl.BlockSpec((pl.Squeezed(), tq, H), lambda b, t: (b, t, 0))
    kv_spec = pl.BlockSpec((pl.Squeezed(), S, H), lambda b, t: (b, 0, 0))   # constant in t -> fetched once per batch
    o_spec = pl.BlockSpec((pl.Squeezed(), tq, H), lambda b, t: (b, t, 0))
    hbm_spec = pl.BlockSpec(memory_space=pl.ANY)                            # weights: manual single-buffer DMA
    bias_spec = pl.BlockSpec((1, H), lambda b, t: (0, 0))                   # tiny, leave to auto-pipeline

    # Advisory cost hint (reflects bf16 q/k, per-batch weight staging, K reuse across tiles).
    flops = B * (8 * S * H * H + 4 * S * S * H)
    transcendentals = B * S * S
    bytes_accessed = (B * S * H * (2 + 2 + 4 + 4)       # q(bf16) + k(bf16) + v(f32) + out(f32)
                      + B * 4 * H * H * 2               # weights staged once per batch
                      + 4 * H * 4)                      # biases

    # VMEM budget: double-buffered activation blocks + single-buffered weights + K scratch.
    est_vmem = (2 * (tq * H * 2 + tq * H * 4)           # q tile (bf16) + out tile (f32)
                + 2 * (S * H * 2 + S * H * 4)           # k (bf16) + v (f32) full-S blocks
                + 4 * H * H * 2 + S * H * 2             # staged weights + projected K
                + 2 * 4 * H * 4)                        # biases
    vmem_limit = min(max(2 * est_vmem, 32 * 1024 * 1024), 64 * 1024 * 1024)

    return pl.pallas_call(
        _attention_kernel,
        out_shape=jax.ShapeDtypeStruct((B, S, H), query.dtype),
        grid_spec=pltpu.PrefetchScalarGridSpec(
            num_scalar_prefetch=0,
            grid=grid,
            in_specs=[q_spec, kv_spec, kv_spec,
                      hbm_spec, hbm_spec, hbm_spec, hbm_spec,   # wq, wk, w1, w2 (HBM refs)
                      bias_spec, bias_spec, bias_spec, bias_spec],
            out_specs=o_spec,
            scratch_shapes=[
                pltpu.VMEM((4, H, H), bf16),          # single-buffered weights [wq, wk, w1, w2]
                pltpu.SemaphoreType.DMA((4,)),        # one DMA semaphore per staged weight
                pltpu.VMEM((S, H), bf16),             # projected K, reused across TQ tiles
            ],
        ),
        compiler_params=pltpu.CompilerParams(
            dimension_semantics=("parallel", "arbitrary"),
            vmem_limit_bytes=vmem_limit,
        ),
        cost_estimate=pl.CostEstimate(flops=flops,
                                      transcendentals=transcendentals,
                                      bytes_accessed=bytes_accessed),
    )(q_bf, k_bf, value,
      wq, wk, w1, w2,
      bq, params["bk"], params["b1"], params["b2"])


def _reference(query, key, value, params):
    """Pure-f32 JAX reference matching the PyTorch forward."""
    H = query.shape[-1]
    Q = query @ params["wq"] + params["bq"]
    K = key @ params["wk"] + params["bk"]
    scores = jnp.einsum("bqh,bkh->bqk", Q, K) / jnp.sqrt(jnp.float32(H))
    attn = jax.nn.softmax(scores, axis=-1)
    weighted = jnp.einsum("bqk,bkh->bqh", attn, value) + value
    h1 = jax.nn.relu(weighted @ params["w1"] + params["b1"])
    return h1 @ params["w2"] + params["b2"] + weighted


def init_params(hidden, key):
    """Deterministic init mimicking torch.nn.Linear (uniform(-1/sqrt(in), 1/sqrt(in)))."""
    bound = 1.0 / jnp.sqrt(jnp.float32(hidden))
    ks = jax.random.split(key, 8)
    u = lambda k, shape: jax.random.uniform(k, shape, jnp.float32, -bound, bound)
    # Note: the torch module also defines value_layer, but forward never uses it.
    return {
        "wq": u(ks[0], (hidden, hidden)), "bq": u(ks[1], (1, hidden)),
        "wk": u(ks[2], (hidden, hidden)), "bk": u(ks[3], (1, hidden)),
        "w1": u(ks[4], (hidden, hidden)), "b1": u(ks[5], (1, hidden)),
        "w2": u(ks[6], (hidden, hidden)), "b2": u(ks[7], (1, hidden)),
    }


if __name__ == "__main__":
    # Small lane-dense demo; tq=128 gives grid=(2, 2) so the TQ-tiling / per-batch
    # weight-staging / K-scratch-reuse paths are all exercised.
    B, S, H = 2, 256, 128
    root = jax.random.PRNGKey(0)
    kq, kk, kv, kp = jax.random.split(root, 4)

    query = jax.random.normal(kq, (B, S, H), jnp.float32)
    key_in = jax.random.normal(kk, (B, S, H), jnp.float32)
    value = jax.random.normal(kv, (B, S, H), jnp.float32)
    params = init_params(H, kp)

    out = attention_pallas(query, key_in, value, params, tq=128)
    out = jax.block_until_ready(out)

    ref = _reference(query, key_in, value, params)
    # bf16 MXU operands (f32 accumulation) + approx softmax reciprocal vs pure-f32 reference.
    assert jnp.allclose(out, ref, atol=4e-2, rtol=4e-2), "mismatch vs reference"

    print("KERNEL_OK")
</pallas_src>

<mosaic_0001>
module attributes {stable_mosaic.version = 11 : i64} {
  func.func @_attention_kernel(%arg0: i32, %arg1: i32, %arg2: memref<1x128x128xbf16, #tpu.memory_space<vmem>>, %arg3: memref<1x256x128xbf16, #tpu.memory_space<vmem>>, %arg4: memref<1x256x128xf32, #tpu.memory_space<vmem>>, %arg5: memref<128x128xbf16, #tpu.memory_space<any>>, %arg6: memref<128x128xbf16, #tpu.memory_space<any>>, %arg7: memref<128x128xbf16, #tpu.memory_space<any>>, %arg8: memref<128x128xbf16, #tpu.memory_space<any>>, %arg9: memref<1x128xf32, #tpu.memory_space<vmem>>, %arg10: memref<1x128xf32, #tpu.memory_space<vmem>>, %arg11: memref<1x128xf32, #tpu.memory_space<vmem>>, %arg12: memref<1x128xf32, #tpu.memory_space<vmem>>, %arg13: memref<1x128x128xf32, #tpu.memory_space<vmem>>, %arg14: memref<4x128x128xbf16, #tpu.memory_space<vmem>>, %arg15: memref<4x!tpu.dma_semaphore, #tpu.memory_space<semaphore_mem>>, %arg16: memref<256x128xbf16, #tpu.memory_space<vmem>>) attributes {dimension_semantics = [#tpu.dimension_semantics<parallel>, #tpu.dimension_semantics<arbitrary>], iteration_bounds = array<i64: 2, 2>, scalar_prefetch = 0 : i64, scratch_operands = 3 : i64, tpu.core_type = #tpu.core_type<tc>, window_params = [{transform_indices = @transform_0, window_bounds = array<i64: 1, 128, 128>}, {transform_indices = @transform_1, window_bounds = array<i64: 1, 256, 128>}, {transform_indices = @transform_2, window_bounds = array<i64: 1, 256, 128>}, {}, {}, {}, {}, {pipeline_mode = #tpu.pipeline_mode<synchronous>, transform_indices = @transform_7, window_bounds = array<i64: 1, 128>}, {pipeline_mode = #tpu.pipeline_mode<synchronous>, transform_indices = @transform_8, window_bounds = array<i64: 1, 128>}, {pipeline_mode = #tpu.pipeline_mode<synchronous>, transform_indices = @transform_9, window_bounds = array<i64: 1, 128>}, {pipeline_mode = #tpu.pipeline_mode<synchronous>, transform_indices = @transform_10, window_bounds = array<i64: 1, 128>}, {transform_indices = @transform_11, window_bounds = array<i64: 1, 128, 128>}]} {
    %c0_i32 = arith.constant 0 : i32
    %0 = arith.cmpi eq, %arg1, %c0_i32 : i32
    %1 = arith.extui %0 : i1 to i32
    %c0_i32_0 = arith.constant 0 : i32
    %2 = arith.cmpi ne, %1, %c0_i32_0 : i32
    scf.if %2 {
      %c0_i32_33 = arith.constant 0 : i32
      %c0_i32_34 = arith.constant 0 : i32
      %c0_i32_35 = arith.constant 0 : i32
      %c0_i32_36 = arith.constant 0 : i32
      %55 = tpu.memref_slice %arg14[%c0_i32_33, %c0_i32_35, %c0_i32_36] : memref<4x128x128xbf16, #tpu.memory_space<vmem>> -> memref<1x128x128xbf16, #tpu.memory_space<vmem>>
      %56 = tpu.memref_squeeze %55 : memref<1x128x128xbf16, #tpu.memory_space<vmem>> -> memref<128x128xbf16, #tpu.memory_space<vmem>>
      %57 = tpu.memref_slice %arg15[%c0_i32_34] : memref<4x!tpu.dma_semaphore, #tpu.memory_space<semaphore_mem>> -> memref<1x!tpu.dma_semaphore, #tpu.memory_space<semaphore_mem>>
      %58 = tpu.memref_squeeze %57 : memref<1x!tpu.dma_semaphore, #tpu.memory_space<semaphore_mem>> -> memref<!tpu.dma_semaphore, #tpu.memory_space<semaphore_mem>>
      tpu.enqueue_dma source(%arg5 : memref<128x128xbf16, #tpu.memory_space<any>>) target(%56 : memref<128x128xbf16, #tpu.memory_space<vmem>>) target_semaphore(%58 : memref<!tpu.dma_semaphore, #tpu.memory_space<semaphore_mem>>)
      %c1_i32 = arith.constant 1 : i32
      %c1_i32_37 = arith.constant 1 : i32
      %c0_i32_38 = arith.constant 0 : i32
      %c0_i32_39 = arith.constant 0 : i32
      %59 = tpu.memref_slice %arg14[%c1_i32, %c0_i32_38, %c0_i32_39] : memref<4x128x128xbf16, #tpu.memory_space<vmem>> -> memref<1x128x128xbf16, #tpu.memory_space<vmem>>
      %60 = tpu.memref_squeeze %59 : memref<1x128x128xbf16, #tpu.memory_space<vmem>> -> memref<128x128xbf16, #tpu.memory_space<vmem>>
      %61 = tpu.memref_slice %arg15[%c1_i32_37] : memref<4x!tpu.dma_semaphore, #tpu.memory_space<semaphore_mem>> -> memref<1x!tpu.dma_semaphore, #tpu.memory_space<semaphore_mem>>
      %62 = tpu.memref_squeeze %61 : memref<1x!tpu.dma_semaphore, #tpu.memory_space<semaphore_mem>> -> memref<!tpu.dma_semaphore, #tpu.memory_space<semaphore_mem>>
      tpu.enqueue_dma source(%arg6 : memref<128x128xbf16, #tpu.memory_space<any>>) target(%60 : memref<128x128xbf16, #tpu.memory_space<vmem>>) target_semaphore(%62 : memref<!tpu.dma_semaphore, #tpu.memory_space<semaphore_mem>>)
      %c2_i32 = arith.constant 2 : i32
      %c2_i32_40 = arith.constant 2 : i32
      %c0_i32_41 = arith.constant 0 : i32
      %c0_i32_42 = arith.constant 0 : i32
      %63 = tpu.memref_slice %arg14[%c2_i32, %c0_i32_41, %c0_i32_42] : memref<4x128x128xbf16, #tpu.memory_space<vmem>> -> memref<1x128x128xbf16, #tpu.memory_space<vmem>>
      %64 = tpu.memref_squeeze %63 : memref<1x128x128xbf16, #tpu.memory_space<vmem>> -> memref<128x128xbf16, #tpu.memory_space<vmem>>
      %65 = tpu.memref_slice %arg15[%c2_i32_40] : memref<4x!tpu.dma_semaphore, #tpu.memory_space<semaphore_mem>> -> memref<1x!tpu.dma_semaphore, #tpu.memory_space<semaphore_mem>>
      %66 = tpu.memref_squeeze %65 : memref<1x!tpu.dma_semaphore, #tpu.memory_space<semaphore_mem>> -> memref<!tpu.dma_semaphore, #tpu.memory_space<semaphore_mem>>
      tpu.enqueue_dma source(%arg7 : memref<128x128xbf16, #tpu.memory_space<any>>) target(%64 : memref<128x128xbf16, #tpu.memory_space<vmem>>) target_semaphore(%66 : memref<!tpu.dma_semaphore, #tpu.memory_space<semaphore_mem>>)
      %c3_i32 = arith.constant 3 : i32
      %c3_i32_43 = arith.constant 3 : i32
      %c0_i32_44 = arith.constant 0 : i32
      %c0_i32_45 = arith.constant 0 : i32
      %67 = tpu.memref_slice %arg14[%c3_i32, %c0_i32_44, %c0_i32_45] : memref<4x128x128xbf16, #tpu.memory_space<vmem>> -> memref<1x128x128xbf16, #tpu.memory_space<vmem>>
      %68 = tpu.memref_squeeze %67 : memref<1x128x128xbf16, #tpu.memory_space<vmem>> -> memref<128x128xbf16, #tpu.memory_space<vmem>>
      %69 = tpu.memref_slice %arg15[%c3_i32_43] : memref<4x!tpu.dma_semaphore, #tpu.memory_space<semaphore_mem>> -> memref<1x!tpu.dma_semaphore, #tpu.memory_space<semaphore_mem>>
      %70 = tpu.memref_squeeze %69 : memref<1x!tpu.dma_semaphore, #tpu.memory_space<semaphore_mem>> -> memref<!tpu.dma_semaphore, #tpu.memory_space<semaphore_mem>>
      tpu.enqueue_dma source(%arg8 : memref<128x128xbf16, #tpu.memory_space<any>>) target(%68 : memref<128x128xbf16, #tpu.memory_space<vmem>>) target_semaphore(%70 : memref<!tpu.dma_semaphore, #tpu.memory_space<semaphore_mem>>)
      %c0_i32_46 = arith.constant 0 : i32
      %c0_i32_47 = arith.constant 0 : i32
      %c0_i32_48 = arith.constant 0 : i32
      %c0_i32_49 = arith.constant 0 : i32
      %71 = tpu.memref_slice %arg14[%c0_i32_46, %c0_i32_48, %c0_i32_49] : memref<4x128x128xbf16, #tpu.memory_space<vmem>> -> memref<1x128x128xbf16, #tpu.memory_space<vmem>>
      %72 = tpu.memref_squeeze %71 : memref<1x128x128xbf16, #tpu.memory_space<vmem>> -> memref<128x128xbf16, #tpu.memory_space<vmem>>
      %73 = tpu.memref_slice %arg15[%c0_i32_47] : memref<4x!tpu.dma_semaphore, #tpu.memory_space<semaphore_mem>> -> memref<1x!tpu.dma_semaphore, #tpu.memory_space<semaphore_mem>>
      %74 = tpu.memref_squeeze %73 : memref<1x!tpu.dma_semaphore, #tpu.memory_space<semaphore_mem>> -> memref<!tpu.dma_semaphore, #tpu.memory_space<semaphore_mem>>
      tpu.wait_dma2 semaphore(%74 : memref<!tpu.dma_semaphore, #tpu.memory_space<semaphore_mem>>) src(%arg5 : memref<128x128xbf16, #tpu.memory_space<any>>) dst(%72 : memref<128x128xbf16, #tpu.memory_space<vmem>>)
      %c1_i32_50 = arith.constant 1 : i32
      %c1_i32_51 = arith.constant 1 : i32
      %c0_i32_52 = arith.constant 0 : i32
      %c0_i32_53 = arith.constant 0 : i32
      %75 = tpu.memref_slice %arg14[%c1_i32_50, %c0_i32_52, %c0_i32_53] : memref<4x128x128xbf16, #tpu.memory_space<vmem>> -> memref<1x128x128xbf16, #tpu.memory_space<vmem>>
      %76 = tpu.memref_squeeze %75 : memref<1x128x128xbf16, #tpu.memory_space<vmem>> -> memref<128x128xbf16, #tpu.memory_space<vmem>>
      %77 = tpu.memref_slice %arg15[%c1_i32_51] : memref<4x!tpu.dma_semaphore, #tpu.memory_space<semaphore_mem>> -> memref<1x!tpu.dma_semaphore, #tpu.memory_space<semaphore_mem>>
      %78 = tpu.memref_squeeze %77 : memref<1x!tpu.dma_semaphore, #tpu.memory_space<semaphore_mem>> -> memref<!tpu.dma_semaphore, #tpu.memory_space<semaphore_mem>>
      tpu.wait_dma2 semaphore(%78 : memref<!tpu.dma_semaphore, #tpu.memory_space<semaphore_mem>>) src(%arg6 : memref<128x128xbf16, #tpu.memory_space<any>>) dst(%76 : memref<128x128xbf16, #tpu.memory_space<vmem>>)
      %c2_i32_54 = arith.constant 2 : i32
      %c2_i32_55 = arith.constant 2 : i32
      %c0_i32_56 = arith.constant 0 : i32
      %c0_i32_57 = arith.constant 0 : i32
      %79 = tpu.memref_slice %arg14[%c2_i32_54, %c0_i32_56, %c0_i32_57] : memref<4x128x128xbf16, #tpu.memory_space<vmem>> -> memref<1x128x128xbf16, #tpu.memory_space<vmem>>
      %80 = tpu.memref_squeeze %79 : memref<1x128x128xbf16, #tpu.memory_space<vmem>> -> memref<128x128xbf16, #tpu.memory_space<vmem>>
      %81 = tpu.memref_slice %arg15[%c2_i32_55] : memref<4x!tpu.dma_semaphore, #tpu.memory_space<semaphore_mem>> -> memref<1x!tpu.dma_semaphore, #tpu.memory_space<semaphore_mem>>
      %82 = tpu.memref_squeeze %81 : memref<1x!tpu.dma_semaphore, #tpu.memory_space<semaphore_mem>> -> memref<!tpu.dma_semaphore, #tpu.memory_space<semaphore_mem>>
      tpu.wait_dma2 semaphore(%82 : memref<!tpu.dma_semaphore, #tpu.memory_space<semaphore_mem>>) src(%arg7 : memref<128x128xbf16, #tpu.memory_space<any>>) dst(%80 : memref<128x128xbf16, #tpu.memory_space<vmem>>)
      %c3_i32_58 = arith.constant 3 : i32
      %c3_i32_59 = arith.constant 3 : i32
      %c0_i32_60 = arith.constant 0 : i32
      %c0_i32_61 = arith.constant 0 : i32
      %83 = tpu.memref_slice %arg14[%c3_i32_58, %c0_i32_60, %c0_i32_61] : memref<4x128x128xbf16, #tpu.memory_space<vmem>> -> memref<1x128x128xbf16, #tpu.memory_space<vmem>>
      %84 = tpu.memref_squeeze %83 : memref<1x128x128xbf16, #tpu.memory_space<vmem>> -> memref<128x128xbf16, #tpu.memory_space<vmem>>
      %85 = tpu.memref_slice %arg15[%c3_i32_59] : memref<4x!tpu.dma_semaphore, #tpu.memory_space<semaphore_mem>> -> memref<1x!tpu.dma_semaphore, #tpu.memory_space<semaphore_mem>>
      %86 = tpu.memref_squeeze %85 : memref<1x!tpu.dma_semaphore, #tpu.memory_space<semaphore_mem>> -> memref<!tpu.dma_semaphore, #tpu.memory_space<semaphore_mem>>
      tpu.wait_dma2 semaphore(%86 : memref<!tpu.dma_semaphore, #tpu.memory_space<semaphore_mem>>) src(%arg8 : memref<128x128xbf16, #tpu.memory_space<any>>) dst(%84 : memref<128x128xbf16, #tpu.memory_space<vmem>>)
      %c0_62 = arith.constant 0 : index
      %c0_63 = arith.constant 0 : index
      %c0_64 = arith.constant 0 : index
      %87 = vector.load %arg3[%c0_62, %c0_63, %c0_64] : memref<1x256x128xbf16, #tpu.memory_space<vmem>>, vector<1x256x128xbf16>
      %88 = vector.shape_cast %87 : vector<1x256x128xbf16> to vector<256x128xbf16>
      %c1 = arith.constant 1 : index
      %c0_65 = arith.constant 0 : index
      %c0_66 = arith.constant 0 : index
      %89 = vector.load %arg14[%c1, %c0_65, %c0_66] : memref<4x128x128xbf16, #tpu.memory_space<vmem>>, vector<1x128x128xbf16>
      %90 = vector.shape_cast %89 : vector<1x128x128xbf16> to vector<128x128xbf16>
      %cst_67 = arith.constant dense<0.000000e+00> : vector<256x128xf32>
      %91 = tpu.matmul %88, %90, %cst_67 {dimension_numbers = #tpu.dot_dimension_numbers<[1], [0], [0], [1], [0, 0, 1, 1], [], []>} : vector<256x128xbf16>, vector<128x128xbf16>, vector<256x128xf32> -> vector<256x128xf32>
      %c0_68 = arith.constant 0 : index
      %c0_69 = arith.constant 0 : index
      %92 = vector.load %arg10[%c0_68, %c0_69] : memref<1x128xf32, #tpu.memory_space<vmem>>, vector<1x128xf32>
      %93 = vector.broadcast %92 : vector<1x128xf32> to vector<256x128xf32>
      %94 = arith.addf %91, %93 : vector<256x128xf32>
      %95 = arith.truncf %94 : vector<256x128xf32> to vector<256x128xbf16>
      %c0_70 = arith.constant 0 : index
      %c0_71 = arith.constant 0 : index
      %96 = vector.load %arg16[%c0_70, %c0_71] : memref<256x128xbf16, #tpu.memory_space<vmem>>, vector<256x128xbf16>
      tpu.vector_store %arg16[%c0_70, %c0_71], %95 {strides = array<i32>} : memref<256x128xbf16, #tpu.memory_space<vmem>>, vector<256x128xbf16>,
    } else {
    }
    %c0 = arith.constant 0 : index
    %c0_1 = arith.constant 0 : index
    %c0_2 = arith.constant 0 : index
    %3 = vector.load %arg2[%c0, %c0_1, %c0_2] : memref<1x128x128xbf16, #tpu.memory_space<vmem>>, vector<1x128x128xbf16>
    %4 = vector.shape_cast %3 : vector<1x128x128xbf16> to vector<128x128xbf16>
    %c0_3 = arith.constant 0 : index
    %c0_4 = arith.constant 0 : index
    %c0_5 = arith.constant 0 : index
    %5 = vector.load %arg14[%c0_3, %c0_4, %c0_5] : memref<4x128x128xbf16, #tpu.memory_space<vmem>>, vector<1x128x128xbf16>
    %6 = vector.shape_cast %5 : vector<1x128x128xbf16> to vector<128x128xbf16>
    %cst = arith.constant dense<0.000000e+00> : vector<128x128xf32>
    %7 = tpu.matmul %4, %6, %cst {dimension_numbers = #tpu.dot_dimension_numbers<[1], [0], [0], [1], [0, 0, 1, 1], [], []>} : vector<128x128xbf16>, vector<128x128xbf16>, vector<128x128xf32> -> vector<128x128xf32>
    %c0_6 = arith.constant 0 : index
    %c0_7 = arith.constant 0 : index
    %8 = vector.load %arg9[%c0_6, %c0_7] : memref<1x128xf32, #tpu.memory_space<vmem>>, vector<1x128xf32>
    %9 = vector.broadcast %8 : vector<1x128xf32> to vector<128x128xf32>
    %10 = arith.addf %7, %9 : vector<128x128xf32>
    %11 = arith.truncf %10 : vector<128x128xf32> to vector<128x128xbf16>
    %c0_8 = arith.constant 0 : index
    %c0_9 = arith.constant 0 : index
    %12 = vector.load %arg16[%c0_8, %c0_9] : memref<256x128xbf16, #tpu.memory_space<vmem>>, vector<256x128xbf16>
    %cst_10 = arith.constant dense<0.000000e+00> : vector<128x256xf32>
    %13 = tpu.matmul %11, %12, %cst_10 {dimension_numbers = #tpu.dot_dimension_numbers<[1], [1], [0], [0], [0, 0, 1, 0], [], []>} : vector<128x128xbf16>, vector<256x128xbf16>, vector<128x256xf32> -> vector<128x256xf32>
    %cst_11 = arith.constant dense<0xFF800000> : vector<128xf32>
    %14 = vector.multi_reduction <maximumf>, %13, %cst_11 [1] : vector<128x256xf32> to vector<128xf32>
    %15 = vector.shape_cast %14 : vector<128xf32> to vector<128x1xf32>
    %16 = vector.broadcast %15 : vector<128x1xf32> to vector<128x256xf32>
    %17 = arith.subf %13, %16 : vector<128x256xf32>
    %18 = math.exp %17 : vector<128x256xf32>
    %cst_12 = arith.constant dense<0.000000e+00> : vector<128xf32>
    %19 = vector.multi_reduction <add>, %18, %cst_12 [1] : vector<128x256xf32> to vector<128xf32>
    %20 = vector.shape_cast %19 : vector<128xf32> to vector<128x1xf32>
    %21 = tpu.reciprocal %20 {approx = true} : vector<128x1xf32> -> vector<128x1xf32>
    %22 = vector.broadcast %21 : vector<128x1xf32> to vector<128x256xf32>
    %23 = arith.mulf %18, %22 : vector<128x256xf32>
    %24 = arith.truncf %23 : vector<128x256xf32> to vector<128x256xbf16>
    %c128_i32 = arith.constant 128 : i32
    %25 = arith.muli %arg1, %c128_i32 : i32
    %26 = tpu.assume_multiple %25, 128 : i32
    %c0_13 = arith.constant 0 : index
    %27 = arith.index_cast %26 : i32 to index
    %c0_14 = arith.constant 0 : index
    %28 = vector.load %arg4[%c0_13, %27, %c0_14] : memref<1x256x128xf32, #tpu.memory_space<vmem>>, vector<1x128x128xf32>
    %29 = vector.shape_cast %28 : vector<1x128x128xf32> to vector<128x128xf32>
    %c0_15 = arith.constant 0 : index
    %c0_16 = arith.constant 0 : index
    %c0_17 = arith.constant 0 : index
    %30 = vector.load %arg4[%c0_15, %c0_16, %c0_17] : memref<1x256x128xf32, #tpu.memory_space<vmem>>, vector<1x256x128xf32>
    %31 = vector.shape_cast %30 : vector<1x256x128xf32> to vector<256x128xf32>
    %32 = arith.truncf %31 : vector<256x128xf32> to vector<256x128xbf16>
    %cst_18 = arith.constant dense<0.000000e+00> : vector<128x128xf32>
    %33 = tpu.matmul %24, %32, %cst_18 {dimension_numbers = #tpu.dot_dimension_numbers<[1], [0], [0], [1], [0, 0, 1, 1], [], []>} : vector<128x256xbf16>, vector<256x128xbf16>, vector<128x128xf32> -> vector<128x128xf32>
    %34 = arith.addf %33, %29 : vector<128x128xf32>
    %35 = arith.truncf %34 : vector<128x128xf32> to vector<128x128xbf16>
    %c2 = arith.constant 2 : index
    %c0_19 = arith.constant 0 : index
    %c0_20 = arith.constant 0 : index
    %36 = vector.load %arg14[%c2, %c0_19, %c0_20] : memref<4x128x128xbf16, #tpu.memory_space<vmem>>, vector<1x128x128xbf16>
    %37 = vector.shape_cast %36 : vector<1x128x128xbf16> to vector<128x128xbf16>
    %cst_21 = arith.constant dense<0.000000e+00> : vector<128x128xf32>
    %38 = tpu.matmul %35, %37, %cst_21 {dimension_numbers = #tpu.dot_dimension_numbers<[1], [0], [0], [1], [0, 0, 1, 1], [], []>} : vector<128x128xbf16>, vector<128x128xbf16>, vector<128x128xf32> -> vector<128x128xf32>
    %c0_22 = arith.constant 0 : index
    %c0_23 = arith.constant 0 : index
    %39 = vector.load %arg11[%c0_22, %c0_23] : memref<1x128xf32, #tpu.memory_space<vmem>>, vector<1x128xf32>
    %40 = vector.broadcast %39 : vector<1x128xf32> to vector<128x128xf32>
    %41 = arith.addf %38, %40 : vector<128x128xf32>
    %cst_24 = arith.constant 0.000000e+00 : f32
    %42 = vector.broadcast %cst_24 : f32 to vector<128x128xf32>
    %43 = arith.maximumf %41, %42 : vector<128x128xf32>
    %44 = arith.truncf %43 : vector<128x128xf32> to vector<128x128xbf16>
    %c3 = arith.constant 3 : index
    %c0_25 = arith.constant 0 : index
    %c0_26 = arith.constant 0 : index
    %45 = vector.load %arg14[%c3, %c0_25, %c0_26] : memref<4x128x128xbf16, #tpu.memory_space<vmem>>, vector<1x128x128xbf16>
    %46 = vector.shape_cast %45 : vector<1x128x128xbf16> to vector<128x128xbf16>
    %cst_27 = arith.constant dense<0.000000e+00> : vector<128x128xf32>
    %47 = tpu.matmul %44, %46, %cst_27 {dimension_numbers = #tpu.dot_dimension_numbers<[1], [0], [0], [1], [0, 0, 1, 1], [], []>} : vector<128x128xbf16>, vector<128x128xbf16>, vector<128x128xf32> -> vector<128x128xf32>
    %c0_28 = arith.constant 0 : index
    %c0_29 = arith.constant 0 : index
    %48 = vector.load %arg12[%c0_28, %c0_29] : memref<1x128xf32, #tpu.memory_space<vmem>>, vector<1x128xf32>
    %49 = vector.broadcast %48 : vector<1x128xf32> to vector<128x128xf32>
    %50 = arith.addf %47, %49 : vector<128x128xf32>
    %51 = arith.addf %50, %34 : vector<128x128xf32>
    %c0_30 = arith.constant 0 : index
    %c0_31 = arith.constant 0 : index
    %c0_32 = arith.constant 0 : index
    %52 = vector.load %arg13[%c0_30, %c0_31, %c0_32] : memref<1x128x128xf32, #tpu.memory_space<vmem>>, vector<1x128x128xf32>
    %53 = vector.shape_cast %52 : vector<1x128x128xf32> to vector<128x128xf32>
    %54 = vector.shape_cast %51 : vector<128x128xf32> to vector<1x128x128xf32>
    tpu.vector_store %arg13[%c0_30, %c0_31, %c0_32], %54 {strides = array<i32>} : memref<1x128x128xf32, #tpu.memory_space<vmem>>, vector<1x128x128xf32>,
    return
  }
  func.func @transform_0(%arg0: i32, %arg1: i32) -> (i32, i32, i32) {
    %c0_i32 = arith.constant 0 : i32
    %c0_i32_0 = arith.constant 0 : i32
    return %arg0, %arg1, %c0_i32 : i32, i32, i32
  }
  func.func @transform_1(%arg0: i32, %arg1: i32) -> (i32, i32, i32) {
    %c0_i32 = arith.constant 0 : i32
    %c0_i32_0 = arith.constant 0 : i32
    %c0_i32_1 = arith.constant 0 : i32
    return %arg0, %c0_i32, %c0_i32_0 : i32, i32, i32
  }
  func.func @transform_2(%arg0: i32, %arg1: i32) -> (i32, i32, i32) {
    %c0_i32 = arith.constant 0 : i32
    %c0_i32_0 = arith.constant 0 : i32
    %c0_i32_1 = arith.constant 0 : i32
    return %arg0, %c0_i32, %c0_i32_0 : i32, i32, i32
  }
  func.func @transform_7(%arg0: i32, %arg1: i32) -> (i32, i32) {
    %c0_i32 = arith.constant 0 : i32
    %c0_i32_0 = arith.constant 0 : i32
    %c0_i32_1 = arith.constant 0 : i32
    return %c0_i32, %c0_i32_0 : i32, i32
  }
  func.func @transform_8(%arg0: i32, %arg1: i32) -> (i32, i32) {
    %c0_i32 = arith.constant 0 : i32
    %c0_i32_0 = arith.constant 0 : i32
    %c0_i32_1 = arith.constant 0 : i32
    return %c0_i32, %c0_i32_0 : i32, i32
  }
  func.func @transform_9(%arg0: i32, %arg1: i32) -> (i32, i32) {
    %c0_i32 = arith.constant 0 : i32
    %c0_i32_0 = arith.constant 0 : i32
    %c0_i32_1 = arith.constant 0 : i32
    return %c0_i32, %c0_i32_0 : i32, i32
  }
  func.func @transform_10(%arg0: i32, %arg1: i32) -> (i32, i32) {
    %c0_i32 = arith.constant 0 : i32
    %c0_i32_0 = arith.constant 0 : i32
    %c0_i32_1 = arith.constant 0 : i32
    return %c0_i32, %c0_i32_0 : i32, i32
  }
  func.func @transform_11(%arg0: i32, %arg1: i32) -> (i32, i32, i32) {
    %c0_i32 = arith.constant 0 : i32
    %c0_i32_0 = arith.constant 0 : i32
    return %arg0, %arg1, %c0_i32 : i32, i32, i32
  }
}

</mosaic_0001>

<bundles_post_ra>
// kernel: tpu_custom_call.1
= control target key start
LH: loop header
LB: loop body
LE: loop exit
PB: predicated region body
PF: predicated region fallthrough
CT: control target
= control target key end

     0   :  { %s3916_s0 = inlined_call_operand.hbm [shape: bf16[2,256,128], index: 0, kind: input, shape index: {}]   ;;  %s3917_s1 = inlined_call_operand.hbm [shape: bf16[2,256,128], index: 1, kind: input, shape index: {}]   ;;  %s3918_s2 = inlined_call_operand.hbm [shape: f32[2,256,128], index: 2, kind: input, shape index: {}]   ;;  %s3919_s3 = inlined_call_operand.hbm [shape: bf16[128,128], index: 3, kind: input, shape index: {}]   ;;  %s3920_s4 = inlined_call_operand.hbm [shape: bf16[128,128], index: 4, kind: input, shape index: {}]   ;;  %s3921_s5 = inlined_call_operand.hbm [shape: bf16[128,128], index: 5, kind: input, shape index: {}]   ;;  %s3922_s6 = inlined_call_operand.hbm [shape: bf16[128,128], index: 6, kind: input, shape index: {}]   ;;  %s3923_s7 = inlined_call_operand.vmem [shape: f32[1,128], index: 7, kind: input, shape index: {}]   ;;  %s3924_s8 = inlined_call_operand.vmem [shape: f32[1,128], index: 8, kind: input, shape index: {}]   ;;  %s3925_s9 = inlined_call_operand.vmem [shape: f32[1,128], index: 9, kind: input, shape index: {}]   ;;  %s3926_s10 = inlined_call_operand.vmem [shape: f32[1,128], index: 10, kind: input, shape index: {}]   ;;  %s3927_s11 = inlined_call_operand.hbm [shape: f32[2,256,128], index: 11, kind: output, shape index: {}]  }
   0x1   :  { %3955 = sst [smem:[#allocation40_spill]] %s3916_s0 }
   0x2   :  { %3956 = sst [smem:[#allocation41_spill]] %s3917_s1 }
   0x3   :  { %3957 = sst [smem:[#allocation42_spill]] %s3918_s2 }
   0x4   :  { %3958 = sst [smem:[#allocation43_spill]] %s3919_s3 }
   0x5   :  { %3959 = sst [smem:[#allocation44_spill]] %s3920_s4 }
   0x6   :  { %3960 = sst [smem:[#allocation45_spill]] %s3921_s5 }
   0x7   :  { %3961 = sst [smem:[#allocation46_spill]] %s3922_s6 }
   0x8   :  { %3962 = sst [smem:[#allocation47_spill]] %s3923_s7 }
   0x9   :  { %3963 = sst [smem:[#allocation48_spill]] %s3924_s8 }
   0xa   :  { %3964 = sst [smem:[#allocation49_spill]] %s3925_s9 }
   0xb   :  { %3965 = sst [smem:[#allocation50_spill]] %s3926_s10 }
   0xc   :  { %3966 = sst [smem:[#allocation51_spill]] %s3927_s11 }
   0xd   :  { %16 = vsyncpa [#allocation6], 0 }
   0xe   :  { %18 = vsyncpa [#allocation6 + $0x1], 0 }
   0xf   :  { %19 = vsyncpa [#allocation9], 0 }
  0x10   :  { %21 = vsyncpa [#allocation9 + $0x1], 0 }
  0x11   :  { %22 = vsyncpa [#allocation7], 0 }
  0x12   :  { %24 = vsyncpa [#allocation7 + $0x1], 0  ;;  %s3018_s17 = smov 0   ;;  %s3020_s18 = smov 0  }
  0x13   :  { %s3022_s19 = smov 0   ;;  %s3024_s20 = smov 0  }
  0x14   :  { %s3026_s21 = smov 0   ;;  %s3028_s22 = smov 0  }
  0x15   :  { %s3030_s23 = smov 0   ;;  %s3032_s24 = smov 0  }
  0x16   :  { %s3034_s25 = smov 0   ;;  %s3036_s26 = smov 0  }
  0x17   :  { %s3038_s27 = smov 0  }
  0x18 LB: > { %3967 = sst [smem:[#allocation29_spill]] %s2906_s18  ;;  %s3072_s28 = sadd.s32 4294967295, %s2942_s27   ;;  %s2942_s27 = sphi %s3038_s27, %s30_s27   ;;  %s2938_s26 = sphi %s3036_s26, %s4027_s26   ;;  %s2934_s25 = sphi %s3034_s25, %s4034_s25   ;;  %s2930_s24 = sphi %s3032_s24, %s4025_s24   ;;  %s2926_s23 = sphi %s3030_s23, %s4033_s23   ;;  %s2922_s22 = sphi %s3028_s22, %s4032_s22   ;;  %s2918_s21 = sphi %s3026_s21, %s4031_s21   ;;  %s2914_s20 = sphi %s3024_s20, %s4030_s20   ;;  %s2910_s19 = sphi %s3022_s19, %s4029_s19   ;;  %s2906_s18 = sphi %s3020_s18, %s4028_s18   ;;  %s2902_s17 = sphi %s3018_s17, %s4024_s17  }
  0x19   : > { %3968 = sst [smem:[#allocation30_spill]] %s2914_s20  ;;  %p3931_p0 = scmp.eq.s32.totalorder %s2942_s27, 0 }
  0x1a   : > { %3969 = sst [smem:[#allocation31_spill]] %s2926_s23  ;;  %p3930_p1 = scmp.eq.s32.totalorder %s3072_s28, 0 }
  0x1b   : > { %3970 = sst [smem:[#allocation32_spill]] %s2930_s24  ;;  %p84_p2 = scmp.ne.s32.totalorder %s2910_s19, %s2906_s18 }
  0x1c   : > { %3971 = sst [smem:[#allocation33_spill]] %s2938_s26  ;;  %p90_p3 = scmp.ne.s32.totalorder %s2906_s18, %s2902_s17 }
  0x1d   : > { %3972 = sst [smem:[#allocation34_spill]] %s3072_s28  ;;  %p3929_p4 = scmp.lt.s32.totalorder %s2942_s27, 4 }
  0x1e   : > { %p86_p5 = por %p84_p2, %p3931_p0  ;;  %p3085_p6 = por %p90_p3, %p3930_p1 }
  0x1f   : > { %s287_s12 = sand.u32 1, %s2942_s27   ;;  %s289_s13 = sand.u32 1, %s2910_s19  }
  0x20   : > { %s3973_s30 = scalar_select %p3085_p6, 1, 0 }
  0x21   : > { %s2007_s14 = sshll.u32 %s289_s13, 7  ;;  %s2058_s15 = sshll.u32 %s2938_s26, 11 }
  0x22   : > { %3974 = sst [smem:[#allocation35_spill]] %s3973_s30  ;;  %s3975_s1 = sld [smem:[#allocation41_spill]] }
  0x23   : > { %s291_s17 = scalar_lea.vmem [#allocation8], %s2007_s14  ;;  %p3101_p7 = pnand %p3929_p4, %p86_p5 }
  0x24   : > { %s298_s29 = sshll.u32 %s291_s17, 4  ;;  %s3105_s9 = sshll.u32 %s289_s13, 8  ;;  %s3097_s29 = int_to_ptr.vmem [resolvable:$true] %s298_s29 }
  0x25   : > { %s3108_s11 = scalar_lea.sflag [#allocation9], %s287_s12  ;;  %p3936_p10 = pneg %p3101_p7 }
  0x28   : > { %s3095_s24 = scalar_lea.hbm %s3975_s1, %s2058_s15  ;;  %s2635_s17 = scalar_lea.hbm %s3975_s1, 4096 }
  0x29   : > { %s2630_s15 = scalar_lea.hbm %s3095_s24, 2048  ;;  %p2636_p13 = scmp.lt.u32.totalorder %s3095_s24, %s3975_s1 }
  0x2a   : > { %p2631_p9 = scmp.ne.s32.totalorder %s3095_s24, %s2630_s15  ;;  %p2637_p2 = scmp.lt.u32.totalorder %s2635_s17, %s2630_s15 }
  0x2b   : > { %p2639_p5 = scmp.lt.u32.totalorder %s2630_s15, %s3095_s24 }
  0x2c   : > { %p2633_p11 = pnand %p3936_p10, %p2631_p9  ;;  %p2638_p3 = por %p2637_p2, %p2636_p13 }
  0x2e   : > { %p2634_p12 = pneg %p2633_p11  ;;  %p2640_p4 = por %p2639_p5, %p2638_p3 }
  0x30   : > { %p2641_p1 = pnand %p2640_p4, %p2634_p12 }
  0x32   : > { %2644 = shalt.err (!%p2641_p1)
}
  0x33   : > { %s2645_s12 = scalar_lea.vmem %s3097_s29, 2048  ;;  %s2944_s13 = smov [#allocation8]  }
  0x34   : > { %p2646_p9 = scmp.ne.s32.totalorder %s3097_s29, %s2645_s12  ;;  %s2650_s14 = sshll.u32 %s2944_s13, 4  ;;  %s2651_s14 = int_to_ptr.vmem [resolvable:$false] %s2650_s14 }
  0x35   : > { %s2652_s7 = scalar_lea.vmem %s2651_s14, 4096  ;;  %p2653_p8 = scmp.lt.s32.totalorder %s3097_s29, %s2651_s14 }
  0x36   : > { %p2648_p11 = pnand %p2646_p9, %p3936_p10  ;;  %p2654_p13 = scmp.lt.s32.totalorder %s2652_s7, %s2645_s12 }
  0x38   : > { %p2649_p0 = pneg %p2648_p11  ;;  %p2655_p2 = por %p2654_p13, %p2653_p8 }
  0x3a   : > { %p2656_p3 = pnand %p2655_p2, %p2649_p0 }
  0x3c   : > { %2659 = shalt.err (!%p2656_p3)
}
  0x3d   : > { %s3932_s8 = smov 64   ;;  %s3933_s15 = smov 4  }
  0x3e   : > { %2402 = dma.hbm_to_vmem [thread:$0]  (!%p3101_p7), %s3095_s24, 2048, %s3097_s29, %s3108_s11, %s3932_s8, %s3932_s8, %s3933_s15  }
  0x3f   : > { %s312_s16 = scalar_lea.vmem [#allocation10], %s3105_s9  ;;  %p327_p0 = scmp.lt.s32.totalorder %s2942_s27, 5 }
  0x40   : > { %s3140_s17 = sshll.u32 %s312_s16, 4  ;;  %p3977_p1 = scmp.ge.s32.totalorder %s2942_s27, 1  ;;  %s3215_s17 = int_to_ptr.vmem [resolvable:$true] %s3140_s17 }
  0x41   : > { %s2000_s13 = sadd.s32 4294967294, %s2942_s27   ;;  %s39_s14 = sadd.s32 1, %s2934_s25 }
  0x42   : > { %p3145_p4 = pnand %p3977_p1, %p327_p0  ;;  %s42_s7 = sadd.s32 1, %s2938_s26 }
  0x43   : > { %p40_p8 = scmp.ge.s32.totalorder %s39_s14, 2  ;;  %s51_s1 = sadd.s32 1, %s2922_s22 }
  0x44   : > { %s3978_s12 = scalar_select %p3145_p4, 1, 0 }
  0x45   : > { %p58_p12 = scmp.ne.s32.totalorder %s2922_s22, %s2918_s21  ;;  %p64_p5 = scmp.ne.s32.totalorder %s2918_s21, %s2914_s20 }
  0x46   : > { %s4036_s14 = smov (%p40_p8, %s39_s14), 0  ;;  %s4038_s7 = smov (!%p40_p8, %s42_s7), %s2938_s26 }
  0x47   : > { %3979 = sst [smem:[#allocation36_spill]] %s4036_s14  ;;  %s47_s9 = ssub.s32 %s2934_s25, %s4036_s14 }
  0x48   : > { %p3980_p9 = scmp.eq.s32.totalorder %s2942_s27, 0  ;;  %p44_p13 = scmp.ge.s32.totalorder %s4038_s7, 2 }
  0x49   : > { %p3982_p2 = scmp.eq.s32.totalorder %s3072_s28, 0  ;;  %p226_p0 = scmp.eq.s32.totalorder %s3072_s28, 3 }
  0x4a   : > { %p3164_p11 = por %p3980_p9, %p58_p12  ;;  %p232_p1 = scmp.eq.s32.totalorder %s2000_s13, 3 }
  0x4b   : > { %p3170_p3 = por %p3982_p2, %p64_p5  ;;  %s4040_s7 = smov (%p44_p13, %s4038_s7), 0 }
  0x4c   : > { %3984 = sst [smem:[#allocation37_spill]] %s4040_s7  ;;  %p3177_p8 = por %p226_p0, %p58_p12 }
  0x4d   : > { %s3983_s29 = scalar_select %p3170_p3, 1, 0 }
  0x4e   : > { %s3985_s16 = scalar_select %p3177_p8, 1, 0 }
  0x4f   : > { %p3181_p9 = por %p232_p1, %p64_p5  ;;  %s46_s15 = ssub.s32 %s2938_s26, %s4040_s7 }
  0x50   : > { %3986 = sst [smem:[#allocation38_spill]] %s3985_s16  ;;  %s264_s14 = sand.u32 1, %s2922_s22  }
  0x51   : > { %s3987_s8 = scalar_select %p3181_p9, 1, 0 }
  0x52   : > { %s48_s20 = sor.u32 %s47_s9, %s46_s15  ;;  %p75_p2 = scmp.eq.s32.totalorder %s46_s15, 0 }
  0x53   : > { %3988 = sst [smem:[#allocation39_spill]] %s3987_s8  ;;  %p49_p10 = scmp.eq.s32.totalorder %s48_s20, 0 }
  0x54   : > { %s3989_s13 = sadd.s32 1, %s2910_s19  ;;  %s2003_s4 = sshll.u32 %s264_s14, 6 }
  0x55   : > { %s3191_s6 = scalar_select %p75_p2, %s2910_s19, %s3989_s13  }
  0x56   : > { %s3194_s5 = scalar_select %p49_p10, %s2922_s22, %s51_s1  }
  0x57   : > { %s2004_s16 = sshll.u32 %s2934_s25, 4  ;;  %s2005_s3 = sshll.u32 %s2938_s26, 5 }
  0x58   : > { %s274_s23 = sadd.s32 %s2005_s3, %s2004_s16  ;;  %s268_s30 = scalar_lea.vmem [#allocation5], %s2003_s4 }
  0x59   : > { %s277_s8 = sshll.u32 %s268_s30, 4  ;;  %s2006_s7 = sshll.u32 %s274_s23, 6  ;;  %s3198_s8 = int_to_ptr.vmem [resolvable:$true] %s277_s8 }
  0x5a   : > { %s3990_s0 = sld [smem:[#allocation40_spill]]  ;;  %p3991_p12 = scmp.lt.s32.totalorder %s2942_s27, 4 }
  0x5b   : > { %s2059_s3 = sshll.u32 %s2938_s26, 12  ;;  %s3993_s2 = sld [smem:[#allocation42_spill]] }
  0x5c   : > { %p3209_p10 = pnand %p3991_p12, %p3164_p11  ;;  %s3222_s23 = scalar_lea.sflag [#allocation6], %s264_s14 }
  0x5e   : > { %p2662_p13 = pneg %p3209_p10 }
  0x60   : > { %s3203_s9 = scalar_lea.hbm %s3990_s0, %s2006_s7  ;;  %s2665_s7 = scalar_lea.hbm %s3990_s0, 4096 }
  0x61   : > { %s3220_s18 = scalar_lea.hbm %s3993_s2, %s2059_s3  ;;  %s2660_s28 = scalar_lea.hbm %s3203_s9, 1024 }
  0x62   : > { %p2661_p5 = scmp.ne.s32.totalorder %s3203_s9, %s2660_s28  ;;  %p2666_p1 = scmp.lt.u32.totalorder %s3203_s9, %s3990_s0 }
  0x63   : > { %p2667_p2 = scmp.lt.u32.totalorder %s2665_s7, %s2660_s28  ;;  %p2669_p9 = scmp.lt.u32.totalorder %s2660_s28, %s3203_s9 }
  0x64   : > { %p2663_p11 = pnand %p2662_p13, %p2661_p5 }
  0x65   : > { %p2668_p12 = por %p2667_p2, %p2666_p1 }
  0x66   : > { %p2664_p0 = pneg %p2663_p11 }
  0x67   : > { %p2670_p8 = por %p2669_p9, %p2668_p12 }
  0x69   : > { %p2671_p6 = pnand %p2670_p8, %p2664_p0 }
  0x6b   : > { %2674 = shalt.err (!%p2671_p6)
}
  0x6c   : > { %s2675_s14 = scalar_lea.vmem %s3198_s8, 1024  ;;  %s2947_s13 = smov [#allocation5]  }
  0x6d   : > { %p2676_p5 = scmp.ne.s32.totalorder %s3198_s8, %s2675_s14  ;;  %s2680_s3 = sshll.u32 %s2947_s13, 4  ;;  %s2681_s3 = int_to_ptr.vmem [resolvable:$false] %s2680_s3 }
  0x6e   : > { %s2682_s4 = scalar_lea.vmem %s2681_s3, 2048  ;;  %p2683_p4 = scmp.lt.s32.totalorder %s3198_s8, %s2681_s3 }
  0x6f   : > { %p2678_p11 = pnand %p2676_p5, %p2662_p13  ;;  %p2684_p1 = scmp.lt.s32.totalorder %s2682_s4, %s2675_s14 }
  0x71   : > { %p2679_p3 = pneg %p2678_p11  ;;  %p2685_p2 = por %p2684_p1, %p2683_p4 }
  0x73   : > { %p2686_p9 = pnand %p2685_p2, %p2679_p3 }
  0x75   : > { %2689 = shalt.err (!%p2686_p9)
}
  0x76   : > { %s3994_s20 = smov 4   ;;  %s3995_s28 = smov 64  }
  0x77   : > { %2399 = dma.hbm_to_vmem [thread:$0]  (!%p3209_p10), %s3203_s9, 1024, %s3198_s8, %s3222_s23, %s3995_s28, %s3995_s28, %s3994_s20  }
  0x78   : > { %s2690_s30 = scalar_lea.hbm %s3220_s18, 4096  ;;  %p3996_p4 = pneg %p3101_p7 }
  0x79   : > { %p2691_p6 = scmp.ne.s32.totalorder %s3220_s18, %s2690_s30  ;;  %s2695_s7 = scalar_lea.hbm %s3993_s2, 8192 }
  0x7a   : > { %p2696_p13 = scmp.lt.u32.totalorder %s3220_s18, %s3993_s2  ;;  %p2697_p0 = scmp.lt.u32.totalorder %s2695_s7, %s2690_s30 }
  0x7b   : > { %p2693_p3 = pnand %p2691_p6, %p3996_p4  ;;  %p2699_p5 = scmp.lt.u32.totalorder %s2690_s30, %s3220_s18 }
  0x7c   : > { %p2698_p12 = por %p2697_p0, %p2696_p13 }
  0x7d   : > { %p2694_p8 = pneg %p2693_p3 }
  0x7e   : > { %p2700_p11 = por %p2699_p5, %p2698_p12 }
  0x80   : > { %p2701_p1 = pnand %p2700_p11, %p2694_p8 }
  0x82   : > { %2704 = shalt.err (!%p2701_p1)
}
  0x83   : > { %s2705_s8 = scalar_lea.vmem %s3215_s17, 4096  ;;  %p3997_p2 = pmov %p3996_p4 }
  0x84   : > { %p2706_p10 = scmp.ne.s32.totalorder %s3215_s17, %s2705_s8  ;;  %s2948_s9 = smov [#allocation10]  }
  0x85   : > { %s2710_s23 = sshll.u32 %s2948_s9, 4  ;;  %s2711_s23 = int_to_ptr.vmem [resolvable:$false] %s2710_s23 }
  0x86   : > { %p2708_p9 = pnand %p2706_p10, %p3997_p2  ;;  %s2712_s14 = scalar_lea.vmem %s2711_s23, 8192 }
  0x87   : > { %p2713_p4 = scmp.lt.s32.totalorder %s3215_s17, %s2711_s23  ;;  %p2714_p3 = scmp.lt.s32.totalorder %s2712_s14, %s2705_s8 }
  0x88   : > { %p2709_p6 = pneg %p2708_p9 }
  0x89   : > { %p2715_p13 = por %p2714_p3, %p2713_p4 }
  0x8b   : > { %p2716_p0 = pnand %p2715_p13, %p2709_p6 }
  0x8d   : > { %2719 = shalt.err (!%p2716_p0)
}
  0x8e   : > { %s2949_s13 = smov 128   ;;  %s2950_s3 = smov 8  }
  0x8f   : > { %2405 = dma.hbm_to_vmem [thread:$0]  (!%p3101_p7), %s3220_s18, 4096, %s3215_s17, %s3108_s11, %s2949_s13, %s2949_s13, %s2950_s3  }
  0x90   : > { %p3998_p8 = scmp.ne.s32.totalorder %s3978_s12, 0 }
  0x91   : > { %s3280_s4 = sand.u32 (!%p3998_p8), 1, %s2918_s21   ;;  %p3999_p12 = scmp.ne.s32.totalorder (!%p3998_p8), %s3983_s29, 0 }
  0x92   : > { %331 = sbr.rel (%p3998_p8) target bundleno = 2070 (0x816), region = 48  ;;  %s2014_s20 = sshll.u32 (!%p3998_p8), %s3280_s4, 6 }
  0x93   : > { %s334_s28 = scalar_lea.sflag (!%p3998_p8), [#allocation6], %s3280_s4  ;;  %s3284_s30 = scalar_lea.vmem (!%p3998_p8), [#allocation5], %s2014_s20 }
  0x99   : > { %2881 = dma.done.wait (%p3999_p12), %s334_s28, 1024  }
  0x9a   : > { %2883 = vsyncadd (%p3999_p12), %s334_s28, 4294966272  ;;  %s4000_s10 = sld [smem:[#allocation34_spill]]  ;;  %s4001_s11 = sld [smem:[#allocation29_spill]] }
  0x9b   : > { %s4002_s17 = sld [smem:[#allocation35_spill]] }
  0xa0   : > { %s342_s12 = sand.u32 1, %s4000_s10   ;;  %s344_s18 = sand.u32 1, %s4001_s11  }
  0xa1   : > { %s2015_s15 = sshll.u32 %s344_s18, 7  ;;  %s343_s1 = scalar_lea.sflag [#allocation9], %s342_s12 }
  0xa2   : > { %s3292_s7 = scalar_lea.vmem [#allocation8], %s2015_s15  ;;  %p4003_p7 = scmp.ne.s32.totalorder %s4002_s17, 0 }
  0xa4   : > { %2885 = dma.done.wait (%p4003_p7), %s343_s1, 6144  }
  0xa5   : > { %2887 = vsyncadd (%p4003_p7), %s343_s1, 4294961152  ;;  %s2016_s24 = sshll.u32 %s344_s18, 8  ;;  %s2017_s16 = sshll.u32 %s3280_s4, 7 }
  0xa6   : > { %s3299_s8 = scalar_lea.vmem [#allocation10], %s2016_s24  ;;  %s3301_s29 = scalar_lea.vmem [#allocation11], %s2017_s16 }
  0xa7   : > { %s4004_s9 = sld [smem:[#allocation31_spill]] }
  0xad   : > { %p2018_p5 = scmp.ne.s32.totalorder %s4004_s9, 0 }
  0xae   : > { %s2951_s23 = smov (!%p2018_p5), [#allocation2]   ;;  %s2952_s13 = smov (!%p2018_p5), [#allocation2 + $0x40]  }
  0xaf   : > { %402 = sbr.rel (%p2018_p5) target bundleno = 547 (0x223), region = 64  ;;  %s410_s14 = sshll.u32 (!%p2018_p5), %s2951_s23, 4  ;;  %s3304_s14 = int_to_ptr.vmem [resolvable:$true] %s410_s14 }
  0xb0   : > { %s423_s3 = sshll.u32 (!%p2018_p5), %s2952_s13, 4  ;;  %s4005_s10 = sld [smem:[#allocation43_spill]] (!%p2018_p5)  ;;  %s424_s3 = int_to_ptr.vmem [resolvable:$true] %s423_s3 }
  0xb6   : > { %s2720_s11 = scalar_lea.hbm %s4005_s10, 1024 }
  0xb7   : > { %p2721_p11 = scmp.ne.s32.totalorder %s4005_s10, %s2720_s11  ;;  %p2724_p1 = scmp.lt.u32.totalorder %s2720_s11, %s4005_s10 }
  0xb9   : > { %p2726_p10 = pnand %p2724_p1, %p2721_p11 }
  0xbb   : > { %2729 = shalt.err (!%p2726_p10)  }
  0xbc   : > { %s2730_s1 = scalar_lea.vmem %s3304_s14, 1024  ;;  %s3318_s24 = scalar_lea.vmem %s3304_s14, 4096 }
  0xbd   : > { %p2731_p2 = scmp.ne.s32.totalorder %s3304_s14, %s2730_s1  ;;  %p2735_p9 = scmp.lt.s32.totalorder %s3304_s14, %s3304_s14 }
  0xbe   : > { %p2736_p6 = scmp.lt.s32.totalorder %s3318_s24, %s2730_s1 }
  0xc0   : > { %p2737_p4 = por %p2736_p6, %p2735_p9 }
  0xc2   : > { %p2738_p3 = pnand %p2737_p4, %p2731_p2 }
  0xc4   : > { %2741 = shalt.err (!%p2738_p3)  }
  0xc5   : > { %413 = dma.hbm_to_vmem [thread:$0]  %s4005_s10, 1024, %s3304_s14, [#allocation3] }
  0xc6   : > { %s4006_s20 = sld [smem:[#allocation44_spill]] }
  0xcc   : > { %s4007_s28 = smov %s4006_s20  ;;  %s2742_s11 = scalar_lea.hbm %s4006_s20, 1024 }
  0xcd   : > { %p2743_p13 = scmp.ne.s32.totalorder %s4007_s28, %s2742_s11  ;;  %p2746_p0 = scmp.lt.u32.totalorder %s2742_s11, %s4007_s28 }
  0xcf   : > { %p2748_p8 = pnand %p2746_p0, %p2743_p13 }
  0xd1   : > { %2751 = shalt.err (!%p2748_p8)  }
  0xd2   : > { %s2752_s1 = scalar_lea.vmem %s424_s3, 1024  ;;  %p2757_p7 = scmp.lt.s32.totalorder %s424_s3, %s3304_s14 }
  0xd3   : > { %p2753_p12 = scmp.ne.s32.totalorder %s424_s3, %s2752_s1  ;;  %p2758_p5 = scmp.lt.s32.totalorder %s3318_s24, %s2752_s1 }
  0xd5   : > { %p2759_p11 = por %p2758_p5, %p2757_p7 }
  0xd7   : > { %p2760_p1 = pnand %p2759_p11, %p2753_p12 }
  0xd9   : > { %2763 = shalt.err (!%p2760_p1)  }
  0xda   : > { %426 = dma.hbm_to_vmem [thread:$0]  %s4007_s28, 1024, %s424_s3, [#allocation3 + $0x1] }
  0xdb   : > { %s2953_s23 = smov [#allocation2 + $0x80]   ;;  %s2954_s20 = smov [#allocation2 + $0xc0]  }
  0xdc   : > { %s436_s13 = sshll.u32 %s2953_s23, 4  ;;  %s449_s17 = sshll.u32 %s2954_s20, 4  ;;  %s437_s13 = int_to_ptr.vmem [resolvable:$true] %s436_s13  ;;  %s450_s17 = int_to_ptr.vmem [resolvable:$true] %s449_s17 }
  0xdd   : > { %s4008_s18 = sld [smem:[#allocation45_spill]] }
  0xe3   : > { %s4009_s15 = smov %s4008_s18  ;;  %s2764_s0 = scalar_lea.hbm %s4008_s18, 1024 }
  0xe4   : > { %p2765_p10 = scmp.ne.s32.totalorder %s4009_s15, %s2764_s0  ;;  %p2768_p2 = scmp.lt.u32.totalorder %s2764_s0, %s4009_s15 }
  0xe6   : > { %p2770_p9 = pnand %p2768_p2, %p2765_p10 }
  0xe8   : > { %2773 = shalt.err (!%p2770_p9)  }
  0xe9   : > { %s2774_s3 = scalar_lea.vmem %s437_s13, 1024  ;;  %p2779_p4 = scmp.lt.s32.totalorder %s437_s13, %s3304_s14 }
  0xea   : > { %p2775_p6 = scmp.ne.s32.totalorder %s437_s13, %s2774_s3  ;;  %p2780_p3 = scmp.lt.s32.totalorder %s3318_s24, %s2774_s3 }
  0xec   : > { %p2781_p13 = por %p2780_p3, %p2779_p4 }
  0xee   : > { %p2782_p0 = pnand %p2781_p13, %p2775_p6 }
  0xf0   : > { %2785 = shalt.err (!%p2782_p0)  }
  0xf1   : > { %439 = dma.hbm_to_vmem [thread:$0]  %s4009_s15, 1024, %s437_s13, [#allocation3 + $0x2] }
  0xf2   : > { %s4010_s23 = sld [smem:[#allocation46_spill]] }
  0xf8   : > { %s4011_s11 = smov %s4010_s23  ;;  %s2786_s26 = scalar_lea.hbm %s4010_s23, 1024 }
  0xf9   : > { %p2787_p8 = scmp.ne.s32.totalorder %s4011_s11, %s2786_s26  ;;  %p2790_p12 = scmp.lt.u32.totalorder %s2786_s26, %s4011_s11 }
  0xfb   : > { %p2792_p7 = pnand %p2790_p12, %p2787_p8 }
  0xfd   : > { %2795 = shalt.err (!%p2792_p7)  }
  0xfe   : > { %s2796_s1 = scalar_lea.vmem %s450_s17, 1024  ;;  %p2801_p11 = scmp.lt.s32.totalorder %s450_s17, %s3304_s14 }
  0xff   : > { %p2797_p5 = scmp.ne.s32.totalorder %s450_s17, %s2796_s1  ;;  %p2802_p1 = scmp.lt.s32.totalorder %s3318_s24, %s2796_s1 }
 0x101   : > { %p2803_p10 = por %p2802_p1, %p2801_p11 }
 0x103   : > { %p2804_p2 = pnand %p2803_p10, %p2797_p5 }
 0x105   : > { %2807 = shalt.err (!%p2804_p2)  }
 0x106   : > { %452 = dma.hbm_to_vmem [thread:$0]  %s4011_s11, 1024, %s450_s17, [#allocation3 + $0x3] }
 0x107   : > { %2888 = dma.done.wait [#allocation3], 1024 }
 0x108   : > { %2889 = vsyncadd [#allocation3], 4294966272 }
 0x109   : > { %2890 = dma.done.wait [#allocation3 + $0x1], 1024 }
 0x10a   : > { %2891 = vsyncadd [#allocation3 + $0x1], 4294966272 }
 0x10b   : > { %2892 = dma.done.wait [#allocation3 + $0x2], 1024 }
 0x10c   : > { %2893 = vsyncadd [#allocation3 + $0x2], 4294966272 }
 0x10d   : > { %2894 = dma.done.wait [#allocation3 + $0x3], 1024 }
 0x10e   : > { %2895 = vsyncadd [#allocation3 + $0x3], 4294966272  ;;  %v495_v0 = vld [vmem:[#allocation2 + $0x40] sm:$0xff]  ;;  %v496_v1 = vld [vmem:[#allocation2 + $0x48] sm:$0xff]  ;;  %s4012_s17 = sld [smem:[#allocation48_spill]] }
 0x10f   : > { %2228 = vmatprep.subr.bf16.mxu0 %v495_v0  ;;  %2372 = vmatprep.subr.bf16.mxu1 %v495_v0  ;;  %v497_v2 = vld [vmem:[#allocation2 + $0x50] sm:$0xff]  ;;  %v2510_v3 = vld [vmem:[%s3292_s7] sm:$0xff]   ;;  %v498_v5 = vld [vmem:[#allocation2 + $0x58] sm:$0xff] }
 0x110   : > { %2229 = vmatpush3.bf16.msra.mxu0 %v495_v0  ;;  %2380 = vmatpush3.bf16.msra.mxu1 %v495_v0  ;;  %v2511_v4 = vld [vmem:[%s3292_s7 + $0x40] sm:$0xff]   ;;  %v500_v7 = vld [vmem:[#allocation2 + $0x68] sm:$0xff]  ;;  %v501_v8 = vld [vmem:[#allocation2 + $0x70] sm:$0xff] }
 0x111   : > { %2230 = vmatprep.subr.bf16.mxu0 %v496_v1  ;;  %2373 = vmatprep.subr.bf16.mxu1 %v496_v1  ;;  %v499_v6 = vld [vmem:[#allocation2 + $0x60] sm:$0xff]  ;;  %v502_v9 = vld [vmem:[#allocation2 + $0x78] sm:$0xff]  ;;  %v2512_v10 = vld [vmem:[%s3292_s7 + $0x8] sm:$0xff]  }
 0x112   : > { %2244 = vmatprep.mubr.bf16.mxu0 %v2510_v3  ;;  %2260 = vmatprep.mubr.bf16.mxu1 %v2511_v4  ;;  %v2513_v11 = vld [vmem:[%s3292_s7 + $0x48] sm:$0xff]   ;;  %v2514_v12 = vld [vmem:[%s3292_s7 + $0x10] sm:$0xff]   ;;  %v2516_v14 = vld [vmem:[%s3292_s7 + $0x18] sm:$0xff]  }
 0x113   : > { %v2515_v13 = vld [vmem:[%s3292_s7 + $0x50] sm:$0xff]   ;;  %v2517_v15 = vld [vmem:[%s3292_s7 + $0x58] sm:$0xff]   ;;  %v2518_v16 = vld [vmem:[%s3292_s7 + $0x20] sm:$0xff]  }
 0x114   : > { %2231 = vmatpush3.bf16.msra.mxu0 %v496_v1  ;;  %2381 = vmatpush3.bf16.msra.mxu1 %v496_v1  ;;  %v2519_v17 = vld [vmem:[%s3292_s7 + $0x60] sm:$0xff]   ;;  %v2520_v18 = vld [vmem:[%s3292_s7 + $0x28] sm:$0xff]   ;;  %v2522_v20 = vld [vmem:[%s3292_s7 + $0x30] sm:$0xff]  }
 0x115   : > { %2232 = vmatprep.subr.bf16.mxu0 %v497_v2  ;;  %2374 = vmatprep.subr.bf16.mxu1 %v497_v2  ;;  %v2521_v19 = vld [vmem:[%s3292_s7 + $0x68] sm:$0xff]   ;;  %v2523_v21 = vld [vmem:[%s3292_s7 + $0x70] sm:$0xff]   ;;  %v2524_v22 = vld [vmem:[%s3292_s7 + $0x38] sm:$0xff]  }
 0x116   : > { %v2525_v23 = vld [vmem:[%s3292_s7 + $0x78] sm:$0xff]   ;;  %v3388_v25 = vld [vmem:[%s4012_s17] ss:$0 sm:$0xff] }
 0x118   : > { %2233 = vmatpush3.bf16.msra.mxu0 %v497_v2  ;;  %2382 = vmatpush3.bf16.msra.mxu1 %v497_v2 }
 0x119   : > { %2234 = vmatprep.subr.bf16.mxu0 %v498_v5  ;;  %2375 = vmatprep.subr.bf16.mxu1 %v498_v5 }
 0x11c   : > { %2235 = vmatpush3.bf16.msra.mxu0 %v498_v5  ;;  %2383 = vmatpush3.bf16.msra.mxu1 %v498_v5 }
 0x11d   : > { %2236 = vmatprep.subr.bf16.mxu0 %v499_v6  ;;  %2376 = vmatprep.subr.bf16.mxu1 %v499_v6 }
 0x120   : > { %2237 = vmatpush3.bf16.msra.mxu0 %v499_v6  ;;  %2384 = vmatpush3.bf16.msra.mxu1 %v499_v6 }
 0x121   : > { %2238 = vmatprep.subr.bf16.mxu0 %v500_v7  ;;  %2377 = vmatprep.subr.bf16.mxu1 %v500_v7 }
 0x124   : > { %2239 = vmatpush3.bf16.msra.mxu0 %v500_v7  ;;  %2385 = vmatpush3.bf16.msra.mxu1 %v500_v7 }
 0x125   : > { %2240 = vmatprep.subr.bf16.mxu0 %v501_v8  ;;  %2378 = vmatprep.subr.bf16.mxu1 %v501_v8 }
 0x128   : > { %2241 = vmatpush3.bf16.msra.mxu0 %v501_v8  ;;  %2386 = vmatpush3.bf16.msra.mxu1 %v501_v8 }
 0x129   : > { %2242 = vmatprep.subr.bf16.mxu0 %v502_v9  ;;  %2379 = vmatprep.subr.bf16.mxu1 %v502_v9 }
 0x12c   : > { %2243 = vmatpush3.bf16.msra.mxu0 %v502_v9  ;;  %2387 = vmatpush3.bf16.msra.mxu1 %v502_v9 }
 0x12f   : > { %2245 = vmatmul.mubr.bf16.vlgmr.msra.gmra.mrb[0].mxu0 %v2512_v10  ;;  %2261 = vmatmul.mubr.bf16.vlgmr.msra.gmra.mrb[0].mxu1 %v2513_v11 }
 0x130   : > { %2248 = vmatprep.mubr.bf16.mxu0 %v2514_v12  ;;  %2264 = vmatprep.mubr.bf16.mxu1 %v2515_v13 }
 0x137   : > { %2249 = vmatmul.mubr.bf16.gmra.mrb[4].mxu0 %v2516_v14  ;;  %2265 = vmatmul.mubr.bf16.gmra.mrb[4].mxu1 %v2517_v15 }
 0x138   : > { %2252 = vmatprep.mubr.bf16.mxu0 %v2518_v16  ;;  %2268 = vmatprep.mubr.bf16.mxu1 %v2519_v17 }
 0x13f   : > { %2253 = vmatmul.mubr.bf16.gmra.mrb[8].mxu0 %v2520_v18  ;;  %2269 = vmatmul.mubr.bf16.gmra.mrb[8].mxu1 %v2521_v19 }
 0x140   : > { %2256 = vmatprep.mubr.bf16.mxu0 %v2522_v20  ;;  %2272 = vmatprep.mubr.bf16.mxu1 %v2523_v21 }
 0x147   : > { %2257 = vmatmul.mubr.bf16.gmra.mrb[12].mxu0 %v2524_v22  ;;  %2273 = vmatmul.mubr.bf16.gmra.mrb[12].mxu1 %v2525_v23 }
 0x202   : > { %v2246_v24 = vpop.f32.mrb[0].mxu0  ;;  %v2262_v26 = vpop.f32.mrb[0].mxu1 }
 0x203   : > { %v640_v27 = vpop.f32.mrb[1].mxu0  ;;  %v704_v28 = vpop.f32.mrb[1].mxu1  ;;  %v649_v31 = vadd.f32 %v2246_v24, %v3388_v25  ;;  %v713_v32 = vadd.f32 %v2262_v26, %v3388_v25 }
 0x204   : > { %v2247_v29 = vpop.f32.mrb[2].mxu0  ;;  %v2263_v30 = vpop.f32.mrb[2].mxu1  ;;  %v641_v37 = vadd.f32 %v3388_v25, %v640_v27  ;;  %v705_v38 = vadd.f32 %v3388_v25, %v704_v28 }
 0x205   : > { %v652_v33 = vadd.f32 %v2247_v29, %v3388_v25  ;;  %v716_v34 = vadd.f32 %v2263_v30, %v3388_v25  ;;  %v643_v35 = vpop.f32.mrb[3].mxu0  ;;  %v707_v36 = vpop.f32.mrb[3].mxu1 }
 0x206   : > { %v644_v39 = vadd.f32 %v3388_v25, %v643_v35  ;;  %v708_v40 = vadd.f32 %v3388_v25, %v707_v36 }
 0x207   : > { %v768_v41 = vpack.c.bf16 %v652_v33, %v649_v31  ;;  %v776_v42 = vpack.c.bf16 %v716_v34, %v713_v32 }
 0x208   : > { %v767_v43 = vpack.c.bf16 %v644_v39, %v641_v37  ;;  %v775_v44 = vpack.c.bf16 %v708_v40, %v705_v38 }
 0x209   : > { %784 = vst [vmem:[#allocation4 + $0x8] sm:$0xff] %v768_v41  ;;  %792 = vst [vmem:[#allocation4 + $0x48] sm:$0xff] %v776_v42 }
 0x20a   : > { %783 = vst [vmem:[#allocation4] sm:$0xff] %v767_v43  ;;  %791 = vst [vmem:[#allocation4 + $0x40] sm:$0xff] %v775_v44  ;;  %v2250_v45 = vpop.f32.mrb[4].mxu0  ;;  %v2266_v46 = vpop.f32.mrb[4].mxu1 }
 0x20b   : > { %v656_v47 = vpop.f32.mrb[5].mxu0  ;;  %v720_v48 = vpop.f32.mrb[5].mxu1  ;;  %v665_v51 = vadd.f32 %v2250_v45, %v3388_v25  ;;  %v729_v52 = vadd.f32 %v2266_v46, %v3388_v25 }
 0x20c   : > { %v2251_v49 = vpop.f32.mrb[6].mxu0  ;;  %v2267_v50 = vpop.f32.mrb[6].mxu1  ;;  %v657_v57 = vadd.f32 %v3388_v25, %v656_v47  ;;  %v721_v58 = vadd.f32 %v3388_v25, %v720_v48 }
 0x20d   : > { %v668_v53 = vadd.f32 %v2251_v49, %v3388_v25  ;;  %v732_v54 = vadd.f32 %v2267_v50, %v3388_v25  ;;  %v659_v55 = vpop.f32.mrb[7].mxu0  ;;  %v723_v56 = vpop.f32.mrb[7].mxu1 }
 0x20e   : > { %v660_v59 = vadd.f32 %v3388_v25, %v659_v55  ;;  %v724_v60 = vadd.f32 %v3388_v25, %v723_v56 }
 0x20f   : > { %v770_v61 = vpack.c.bf16 %v668_v53, %v665_v51  ;;  %v778_v62 = vpack.c.bf16 %v732_v54, %v729_v52 }
 0x210   : > { %v769_v63 = vpack.c.bf16 %v660_v59, %v657_v57  ;;  %v777_v0 = vpack.c.bf16 %v724_v60, %v721_v58 }
 0x211   : > { %786 = vst [vmem:[#allocation4 + $0x18] sm:$0xff] %v770_v61  ;;  %794 = vst [vmem:[#allocation4 + $0x58] sm:$0xff] %v778_v62 }
 0x212   : > { %785 = vst [vmem:[#allocation4 + $0x10] sm:$0xff] %v769_v63  ;;  %793 = vst [vmem:[#allocation4 + $0x50] sm:$0xff] %v777_v0  ;;  %v2254_v1 = vpop.f32.mrb[8].mxu0  ;;  %v2270_v2 = vpop.f32.mrb[8].mxu1 }
 0x213   : > { %v672_v3 = vpop.f32.mrb[9].mxu0  ;;  %v736_v4 = vpop.f32.mrb[9].mxu1  ;;  %v681_v7 = vadd.f32 %v2254_v1, %v3388_v25  ;;  %v745_v8 = vadd.f32 %v2270_v2, %v3388_v25 }
 0x214   : > { %v2255_v5 = vpop.f32.mrb[10].mxu0  ;;  %v2271_v6 = vpop.f32.mrb[10].mxu1  ;;  %v673_v13 = vadd.f32 %v3388_v25, %v672_v3  ;;  %v737_v14 = vadd.f32 %v3388_v25, %v736_v4 }
 0x215   : > { %v684_v9 = vadd.f32 %v2255_v5, %v3388_v25  ;;  %v748_v10 = vadd.f32 %v2271_v6, %v3388_v25  ;;  %v675_v11 = vpop.f32.mrb[11].mxu0  ;;  %v739_v12 = vpop.f32.mrb[11].mxu1 }
 0x216   : > { %v676_v15 = vadd.f32 %v3388_v25, %v675_v11  ;;  %v740_v16 = vadd.f32 %v3388_v25, %v739_v12 }
 0x217   : > { %v772_v17 = vpack.c.bf16 %v684_v9, %v681_v7  ;;  %v780_v18 = vpack.c.bf16 %v748_v10, %v745_v8 }
 0x218   : > { %v771_v19 = vpack.c.bf16 %v676_v15, %v673_v13  ;;  %v779_v20 = vpack.c.bf16 %v740_v16, %v737_v14 }
 0x219   : > { %788 = vst [vmem:[#allocation4 + $0x28] sm:$0xff] %v772_v17  ;;  %796 = vst [vmem:[#allocation4 + $0x68] sm:$0xff] %v780_v18 }
 0x21a   : > { %787 = vst [vmem:[#allocation4 + $0x20] sm:$0xff] %v771_v19  ;;  %795 = vst [vmem:[#allocation4 + $0x60] sm:$0xff] %v779_v20  ;;  %v2258_v21 = vpop.f32.mrb[12].mxu0  ;;  %v2274_v22 = vpop.f32.mrb[12].mxu1 }
 0x21b   : > { %v688_v23 = vpop.f32.mrb[13].mxu0  ;;  %v752_v24 = vpop.f32.mrb[13].mxu1  ;;  %v697_v28 = vadd.f32 %v2258_v21, %v3388_v25  ;;  %v761_v29 = vadd.f32 %v2274_v22, %v3388_v25 }
 0x21c   : > { %v2259_v26 = vpop.f32.mrb[14].mxu0  ;;  %v2275_v27 = vpop.f32.mrb[14].mxu1  ;;  %v689_v34 = vadd.f32 %v3388_v25, %v688_v23  ;;  %v753_v35 = vadd.f32 %v3388_v25, %v752_v24 }
 0x21d   : > { %v700_v30 = vadd.f32 %v2259_v26, %v3388_v25  ;;  %v764_v31 = vadd.f32 %v2275_v27, %v3388_v25  ;;  %v691_v32 = vpop.f32.mrb[15].mxu0  ;;  %v755_v33 = vpop.f32.mrb[15].mxu1 }
 0x21e   : > { %v692_v36 = vadd.f32 %v3388_v25, %v691_v32  ;;  %v756_v37 = vadd.f32 %v3388_v25, %v755_v33 }
 0x21f   : > { %v774_v38 = vpack.c.bf16 %v700_v30, %v697_v28  ;;  %v782_v39 = vpack.c.bf16 %v764_v31, %v761_v29 }
 0x220   : > { %v773_v40 = vpack.c.bf16 %v692_v36, %v689_v34  ;;  %v781_v41 = vpack.c.bf16 %v756_v37, %v753_v35 }
 0x221   : > { %790 = vst [vmem:[#allocation4 + $0x38] sm:$0xff] %v774_v38  ;;  %798 = vst [vmem:[#allocation4 + $0x78] sm:$0xff] %v782_v39 }
 0x222   : > { %789 = vst [vmem:[#allocation4 + $0x30] sm:$0xff] %v773_v40  ;;  %797 = vst [vmem:[#allocation4 + $0x70] sm:$0xff] %v781_v41 }
 0x223 PF: > { %v815_v42 = vld [vmem:[#allocation2] sm:$0xff]  ;;  %v816_v43 = vld [vmem:[#allocation2 + $0x8] sm:$0xff]  ;;  %v817_v45 = vld [vmem:[#allocation2 + $0x10] sm:$0xff]  ;;  %s4013_s9 = sld [smem:[#allocation47_spill]]  ;;  %s4015_s26 = sld [smem:[#allocation49_spill]] }
 0x224   : > { %2276 = vmatprep.subr.bf16.mxu0 %v815_v42  ;;  %v2526_v44 = vld [vmem:[%s3284_s30] sm:$0xff]   ;;  %v818_v25 = vld [vmem:[#allocation2 + $0x18] sm:$0xff]  ;;  %v992_v48 = vld [vmem:[#allocation4 + $0x48] sm:$0xff]  ;;  %s4016_s12 = sld [smem:[#allocation50_spill]]  ;;  %s1837_s24 = sshll.u32 %s3301_s29, 4  ;;  %s3849_s24 = int_to_ptr.vmem [resolvable:$true] %s1837_s24 }
 0x225   : > { %2277 = vmatpush3.bf16.msra.mxu0 %v815_v42  ;;  %2292 = vmatprep.mubr.bf16.mxu0 %v2526_v44  ;;  %v991_v46 = vld [vmem:[#allocation4 + $0x40] sm:$0xff]  ;;  %v820_v50 = vld [vmem:[#allocation2 + $0x28] sm:$0xff]  ;;  %v993_v52 = vld [vmem:[#allocation4 + $0x50] sm:$0xff]  ;;  %s4017_s18 = sld [smem:[#allocation32_spill]]  ;;  %s4018_s17 = sld [smem:[#allocation38_spill]] }
 0x226   : > { %2278 = vmatprep.subr.bf16.mxu0 %v816_v43  ;;  %2100 = vmatprep.subr.bf16.mxu1 %v991_v46  ;;  %v983_v47 = vld [vmem:[#allocation4] sm:$0xff]  ;;  %v984_v51 = vld [vmem:[#allocation4 + $0x8] sm:$0xff]  ;;  %v821_v53 = vld [vmem:[#allocation2 + $0x30] sm:$0xff] }
 0x227   : > { %v819_v49 = vld [vmem:[#allocation2 + $0x20] sm:$0xff]  ;;  %2101 = vmatpush3.bf16.xpose.msra.mxu1 %v983_v47  ;;  %v822_v54 = vld [vmem:[#allocation2 + $0x38] sm:$0xff]  ;;  %v985_v55 = vld [vmem:[#allocation4 + $0x10] sm:$0xff] }
 0x228   : > { %2102 = vmatprep.subr.bf16.mxu1 %v992_v48  ;;  %v994_v56 = vld [vmem:[#allocation4 + $0x58] sm:$0xff]  ;;  %v2527_v57 = vld [vmem:[%s3284_s30 + $0x8] sm:$0xff]   ;;  %v2528_v58 = vld [vmem:[%s3284_s30 + $0x10] sm:$0xff]  }
 0x229   : > { %2279 = vmatpush3.bf16.msra.mxu0 %v816_v43  ;;  %v986_v59 = vld [vmem:[#allocation4 + $0x18] sm:$0xff]  ;;  %v995_v60 = vld [vmem:[#allocation4 + $0x60] sm:$0xff]  ;;  %v996_v0 = vld [vmem:[#allocation4 + $0x68] sm:$0xff] }
 0x22a   : > { %2280 = vmatprep.subr.bf16.mxu0 %v817_v45  ;;  %v2529_v61 = vld [vmem:[%s3284_s30 + $0x18] sm:$0xff]   ;;  %v2530_v62 = vld [vmem:[%s3284_s30 + $0x20] sm:$0xff]   ;;  %v2531_v1 = vld [vmem:[%s3284_s30 + $0x28] sm:$0xff]  }
 0x22b   : > { %v987_v63 = vld [vmem:[#allocation4 + $0x20] sm:$0xff]  ;;  %v2532_v2 = vld [vmem:[%s3284_s30 + $0x30] sm:$0xff]   ;;  %v988_v3 = vld [vmem:[#allocation4 + $0x28] sm:$0xff]  ;;  %s2050_s13 = sshll.u32 %s4017_s18, 5  ;;  %p4020_p6 = scmp.ne.s32.totalorder %s4018_s17, 0 }
 0x22c   : > { %v997_v4 = vld [vmem:[#allocation4 + $0x70] sm:$0xff]  ;;  %v2533_v5 = vld [vmem:[%s3284_s30 + $0x38] sm:$0xff]   ;;  %v2036_v10 = vld [vmem:[%s4013_s9] ss:$0 sm:$0xff]  ;;  %s4014_s30 = sld [smem:[#allocation31_spill]]  ;;  %s4019_s9 = sld [smem:[#allocation51_spill]] }
 0x22d   : > { %2281 = vmatpush3.bf16.msra.mxu0 %v817_v45  ;;  %v989_v6 = vld [vmem:[#allocation4 + $0x30] sm:$0xff]  ;;  %v998_v7 = vld [vmem:[#allocation4 + $0x78] sm:$0xff] }
 0x22e   : > { %2282 = vmatprep.subr.bf16.mxu0 %v818_v25  ;;  %v990_v8 = vld [vmem:[#allocation4 + $0x38] sm:$0xff] }
 0x22f   : > { %2103 = vmatpush3.bf16.xpose.msra.mxu1 %v984_v51 }
 0x230   : > { %2104 = vmatprep.subr.bf16.mxu1 %v993_v52 }
 0x231   : > { %2283 = vmatpush3.bf16.msra.mxu0 %v818_v25 }
 0x232   : > { %2284 = vmatprep.subr.bf16.mxu0 %v819_v49  ;;  %s2045_s2 = sshll.u32 %s4014_s30, 7  ;;  %s2049_s1 = sshll.u32 %s4014_s30, 4 }
 0x233   : > { %s3723_s10 = scalar_lea.vmem %s3299_s8, %s2045_s2 [#allocation10]  ;;  %s1834_s3 = sadd.s32 %s2050_s13, %s2049_s1 }
 0x234   : > { %s2051_s14 = sshll.u32 %s1834_s3, 7  ;;  %s1822_s2 = scalar_lea.sflag [#allocation7], %s3280_s4 }
 0x235   : > { %2285 = vmatpush3.bf16.msra.mxu0 %v819_v49  ;;  %s3847_s30 = scalar_lea.hbm %s4019_s9, %s2051_s14 }
 0x236   : > { %2286 = vmatprep.subr.bf16.mxu0 %v820_v50 }
 0x237   : > { %2105 = vmatpush3.bf16.xpose.msra.mxu1 %v985_v55 }
 0x238   : > { %2106 = vmatprep.subr.bf16.mxu1 %v994_v56 }
 0x239   : > { %2287 = vmatpush3.bf16.msra.mxu0 %v820_v50 }
 0x23a   : > { %2288 = vmatprep.subr.bf16.mxu0 %v821_v53 }
 0x23d   : > { %2289 = vmatpush3.bf16.msra.mxu0 %v821_v53 }
 0x23e   : > { %2290 = vmatprep.subr.bf16.mxu0 %v822_v54 }
 0x23f   : > { %2107 = vmatpush3.bf16.xpose.msra.mxu1 %v986_v59 }
 0x240   : > { %2108 = vmatprep.subr.bf16.mxu1 %v995_v60 }
 0x241   : > { %2291 = vmatpush3.bf16.msra.mxu0 %v822_v54 }
 0x244   : > { %2293 = vmatmul.mubr.bf16.vlgmr.msra.gmra.mrb[0].mxu0 %v2527_v57 }
 0x245   : > { %2296 = vmatprep.mubr.bf16.mxu0 %v2528_v58 }
 0x247   : > { %2109 = vmatpush3.bf16.xpose.msra.mxu1 %v987_v63 }
 0x248   : > { %2110 = vmatprep.subr.bf16.mxu1 %v996_v0 }
 0x24c   : > { %2297 = vmatmul.mubr.bf16.gmra.mrb[4].mxu0 %v2529_v61 }
 0x24d   : > { %2300 = vmatprep.mubr.bf16.mxu0 %v2530_v62 }
 0x24f   : > { %2111 = vmatpush3.bf16.xpose.msra.mxu1 %v988_v3 }
 0x250   : > { %2112 = vmatprep.subr.bf16.mxu1 %v997_v4 }
 0x254   : > { %2301 = vmatmul.mubr.bf16.gmra.mrb[8].mxu0 %v2531_v1 }
 0x255   : > { %2304 = vmatprep.mubr.bf16.mxu0 %v2532_v2 }
 0x257   : > { %2113 = vmatpush3.bf16.xpose.msra.mxu1 %v989_v6 }
 0x258   : > { %2114 = vmatprep.subr.bf16.mxu1 %v998_v7 }
 0x25c   : > { %2305 = vmatmul.mubr.bf16.gmra.mrb[12].mxu0 %v2533_v5 }
 0x25f   : > { %2115 = vmatpush3.bf16.xpose.msra.mxu1 %v990_v8 }
 0x317   : > { %v2294_v9 = vpop.f32.mrb[0].mxu0 }
 0x318   : > { %v912_v11 = vpop.f32.mrb[1].mxu0  ;;  %v921_v13 = vadd.f32 %v2294_v9, %v2036_v10 }
 0x319   : > { %v2295_v12 = vpop.f32.mrb[2].mxu0  ;;  %v913_v16 = vadd.f32 %v2036_v10, %v912_v11 }
 0x31a   : > { %v924_v14 = vadd.f32 %v2295_v12, %v2036_v10  ;;  %v915_v15 = vpop.f32.mrb[3].mxu0 }
 0x31b   : > { %v916_v17 = vadd.f32 %v2036_v10, %v915_v15 }
 0x31c   : > { %v976_v18 = vpack.c.bf16 %v924_v14, %v921_v13 }
 0x31d   : > { %v975_v19 = vpack.c.bf16 %v916_v17, %v913_v16 }
 0x31f   : > { %2116 = vmatprep.mubr.bf16.mxu1 %v975_v19  ;;  %v2298_v20 = vpop.f32.mrb[4].mxu0 }
 0x320   : > { %2117 = vmatmul.mubr.bf16.vlgmr.msra.gmra.mrb[0].mxu1 %v975_v19  ;;  %v937_v21 = vadd.f32 %v2298_v20, %v2036_v10  ;;  %v928_v22 = vpop.f32.mrb[5].mxu0 }
 0x321   : > { %2118 = vmatprep.mubr.bf16.mxu1 %v976_v18  ;;  %v929_v23 = vadd.f32 %v2036_v10, %v928_v22  ;;  %v2299_v24 = vpop.f32.mrb[6].mxu0 }
 0x322   : > { %v940_v26 = vadd.f32 %v2299_v24, %v2036_v10  ;;  %v931_v27 = vpop.f32.mrb[7].mxu0 }
 0x323   : > { %v932_v28 = vadd.f32 %v2036_v10, %v931_v27 }
 0x324   : > { %v978_v29 = vpack.c.bf16 %v940_v26, %v937_v21 }
 0x325   : > { %v977_v30 = vpack.c.bf16 %v932_v28, %v929_v23 }
 0x327   : > { %v2302_v31 = vpop.f32.mrb[8].mxu0 }
 0x328   : > { %2119 = vmatmul.mubr.bf16.gmra.mrb[4].mxu1 %v976_v18  ;;  %v953_v32 = vadd.f32 %v2302_v31, %v2036_v10  ;;  %v944_v33 = vpop.f32.mrb[9].mxu0 }
 0x329   : > { %2120 = vmatprep.mubr.bf16.mxu1 %v977_v30  ;;  %v945_v34 = vadd.f32 %v2036_v10, %v944_v33  ;;  %v2303_v35 = vpop.f32.mrb[10].mxu0 }
 0x32a   : > { %v956_v36 = vadd.f32 %v2303_v35, %v2036_v10  ;;  %v947_v37 = vpop.f32.mrb[11].mxu0  ;;  %v1402_v35 = vld [vmem:[%s3299_s8 + $0x80] sm:$0xff] }
 0x32b   : > { %v948_v38 = vadd.f32 %v2036_v10, %v947_v37  ;;  %v1386_v37 = vld [vmem:[%s3299_s8] sm:$0xff] }
 0x32c   : > { %v980_v39 = vpack.c.bf16 %v956_v36, %v953_v32  ;;  %v1403_v36 = vld [vmem:[%s3299_s8 + $0x88] sm:$0xff] }
 0x32d   : > { %v979_v40 = vpack.c.bf16 %v948_v38, %v945_v34  ;;  %v1426_v38 = vpack.c.bf16 %v1403_v36, %v1402_v35 }
 0x32f   : > { %v2306_v41 = vpop.f32.mrb[12].mxu0  ;;  %2132 = vmatprep.subr.bf16.mxu0 %v1426_v38 }
 0x330   : > { %2121 = vmatmul.mubr.bf16.gmra.mrb[8].mxu1 %v977_v30  ;;  %v969_v42 = vadd.f32 %v2306_v41, %v2036_v10  ;;  %v960_v43 = vpop.f32.mrb[13].mxu0  ;;  %v1405_v41 = vld [vmem:[%s3299_s8 + $0x98] sm:$0xff] }
 0x331   : > { %2122 = vmatprep.mubr.bf16.mxu1 %v978_v29  ;;  %v961_v44 = vadd.f32 %v2036_v10, %v960_v43  ;;  %v2307_v45 = vpop.f32.mrb[14].mxu0 }
 0x332   : > { %v972_v25 = vadd.f32 %v2307_v45, %v2036_v10  ;;  %v963_v46 = vpop.f32.mrb[15].mxu0  ;;  %v1389_v45 = vld [vmem:[%s3299_s8 + $0x18] sm:$0xff] }
 0x333   : > { %v964_v47 = vadd.f32 %v2036_v10, %v963_v46  ;;  %v1407_v46 = vld [vmem:[%s3299_s8 + $0xa8] sm:$0xff] }
 0x334   : > { %v982_v48 = vpack.c.bf16 %v972_v25, %v969_v42  ;;  %v1406_v25 = vld [vmem:[%s3299_s8 + $0xa0] sm:$0xff] }
 0x335   : > { %v981_v49 = vpack.c.bf16 %v964_v47, %v961_v44  ;;  %v1388_v44 = vld [vmem:[%s3299_s8 + $0x10] sm:$0xff] }
 0x336   : > { %v1419_v47 = vpack.c.bf16 %v1389_v45, %v1388_v44 }
 0x338   : > { %2123 = vmatmul.mubr.bf16.gmra.mrb[12].mxu1 %v978_v29 }
 0x339   : > { %2124 = vmatprep.mubr.bf16.mxu1 %v979_v40 }
 0x340   : > { %2125 = vmatmul.mubr.bf16.gmra.mrb[16].mxu1 %v979_v40  ;;  %v1404_v40 = vld [vmem:[%s3299_s8 + $0x90] sm:$0xff] }
 0x341   : > { %2126 = vmatprep.mubr.bf16.mxu1 %v980_v39  ;;  %v1427_v43 = vpack.c.bf16 %v1405_v41, %v1404_v40 }
 0x348   : > { %2127 = vmatmul.mubr.bf16.gmra.mrb[20].mxu1 %v980_v39  ;;  %v1387_v39 = vld [vmem:[%s3299_s8 + $0x8] sm:$0xff] }
 0x349   : > { %2128 = vmatprep.mubr.bf16.mxu1 %v981_v49  ;;  %v1418_v42 = vpack.c.bf16 %v1387_v39, %v1386_v37 }
 0x34b   : > { %2133 = vmatpush3.bf16.msra.mxu0 %v1418_v42 }
 0x34c   : > { %2134 = vmatprep.subr.bf16.mxu0 %v1427_v43 }
 0x34f   : > { %2135 = vmatpush3.bf16.msra.mxu0 %v1419_v47 }
 0x350   : > { %2129 = vmatmul.mubr.bf16.gmra.mrb[24].mxu1 %v981_v49  ;;  %v1390_v49 = vld [vmem:[%s3299_s8 + $0x20] sm:$0xff] }
 0x351   : > { %2130 = vmatprep.mubr.bf16.mxu1 %v982_v48 }
 0x358   : > { %2131 = vmatmul.mubr.bf16.gmra.mrb[28].mxu1 %v982_v48  ;;  %v1428_v48 = vpack.c.bf16 %v1407_v46, %v1406_v25 }
 0x35a   : > { %2136 = vmatprep.subr.bf16.mxu0 %v1428_v48 }
 0x3f3   : > { %v3433_v50 = vpop.f32.mrb[0].mxu1 }
 0x3f4   : > { %v3435_v51 = vpop.f32.mrb[1].mxu1 }
 0x3f5   : > { %v3437_v52 = vpop.f32.mrb[2].mxu1  ;;  %v1112_v53 = vmax.f32 %v3433_v50, %v3435_v51 }
 0x3f6   : > { %v3441_v54 = vpop.f32.mrb[3].mxu1 }
 0x3f7   : > { %1113 = vmax.xlane.f32.xlu0 %v1112_v53  ;;  %v1115_v55 = vmax.f32 %v3437_v52, %v3441_v54  ;;  %v1391_v53 = vld [vmem:[%s3299_s8 + $0x28] sm:$0xff] }
 0x3fb   : > { %1116 = vmax.xlane.f32.xlu0 %v1115_v55  ;;  %v3445_v56 = vpop.f32.mrb[4].mxu1  ;;  %v1408_v55 = vld [vmem:[%s3299_s8 + $0xb0] sm:$0xff] }
 0x3fc   : > { %v3447_v57 = vpop.f32.mrb[5].mxu1 }
 0x3fd   : > { %v3449_v58 = vpop.f32.mrb[6].mxu1  ;;  %v1118_v59 = vmax.f32 %v3445_v56, %v3447_v57 }
 0x3fe   : > { %v3453_v60 = vpop.f32.mrb[7].mxu1 }
 0x3ff   : > { %1119 = vmax.xlane.f32.xlu1 %v1118_v59  ;;  %v1121_v61 = vmax.f32 %v3449_v58, %v3453_v60  ;;  %v1409_v59 = vld [vmem:[%s3299_s8 + $0xb8] sm:$0xff] }
 0x403   : > { %1122 = vmax.xlane.f32.xlu1 %v1121_v61  ;;  %v3457_v62 = vpop.f32.mrb[8].mxu1  ;;  %v1420_v61 = vpack.c.bf16 %v1391_v53, %v1390_v49 }
 0x404   : > { %v3459_v63 = vpop.f32.mrb[9].mxu1 }
 0x405   : > { %v3461_v0 = vpop.f32.mrb[10].mxu1  ;;  %v1124_v1 = vmax.f32 %v3457_v62, %v3459_v63  ;;  %2137 = vmatpush3.bf16.msra.mxu0 %v1420_v61 }
 0x406   : > { %v3465_v2 = vpop.f32.mrb[11].mxu1 }
 0x407   : > { %1125 = vmax.xlane.f32.xlu0 %v1124_v1  ;;  %v1127_v3 = vmax.f32 %v3461_v0, %v3465_v2  ;;  %v1429_v1 = vpack.c.bf16 %v1409_v59, %v1408_v55 }
 0x409   : > { %1128 = vmax.xlane.f32.xlu1 %v1127_v3  ;;  %2138 = vmatprep.subr.bf16.mxu0 %v1429_v1 }
 0x40b   : > { %v3469_v4 = vpop.f32.mrb[12].mxu1 }
 0x40c   : > { %v3471_v5 = vpop.f32.mrb[13].mxu1 }
 0x40d   : > { %v3473_v6 = vpop.f32.mrb[14].mxu1  ;;  %v1130_v7 = vmax.f32 %v3469_v4, %v3471_v5 }
 0x40e   : > { %v3477_v8 = vpop.f32.mrb[15].mxu1 }
 0x40f   : > { %1131 = vmax.xlane.f32.xlu0 %v1130_v7  ;;  %v1133_v9 = vmax.f32 %v3473_v6, %v3477_v8 }
 0x411   : > { %1134 = vmax.xlane.f32.xlu1 %v1133_v9 }
 0x413   : > { %v3481_v10 = vpop.f32.mrb[16].mxu1 }
 0x414   : > { %v3483_v11 = vpop.f32.mrb[17].mxu1 }
 0x415   : > { %v3485_v12 = vpop.f32.mrb[18].mxu1  ;;  %v1136_v13 = vmax.f32 %v3481_v10, %v3483_v11 }
 0x416   : > { %v3489_v14 = vpop.f32.mrb[19].mxu1 }
 0x417   : > { %1137 = vmax.xlane.f32.xlu0 %v1136_v13  ;;  %v1139_v15 = vmax.f32 %v3485_v12, %v3489_v14 }
 0x419   : > { %1140 = vmax.xlane.f32.xlu1 %v1139_v15 }
 0x41b   : > { %v3493_v16 = vpop.f32.mrb[20].mxu1 }
 0x41c   : > { %v3495_v17 = vpop.f32.mrb[21].mxu1 }
 0x41d   : > { %v3497_v18 = vpop.f32.mrb[22].mxu1  ;;  %v1142_v19 = vmax.f32 %v3493_v16, %v3495_v17 }
 0x41e   : > { %v3501_v20 = vpop.f32.mrb[23].mxu1 }
 0x41f   : > { %1143 = vmax.xlane.f32.xlu0 %v1142_v19  ;;  %v1145_v21 = vmax.f32 %v3497_v18, %v3501_v20 }
 0x421   : > { %1146 = vmax.xlane.f32.xlu1 %v1145_v21 }
 0x423   : > { %v3505_v22 = vpop.f32.mrb[24].mxu1 }
 0x424   : > { %v3507_v23 = vpop.f32.mrb[25].mxu1 }
 0x425   : > { %v3509_v24 = vpop.f32.mrb[26].mxu1  ;;  %v1148_v26 = vmax.f32 %v3505_v22, %v3507_v23 }
 0x426   : > { %v3513_v27 = vpop.f32.mrb[27].mxu1 }
 0x427   : > { %1149 = vmax.xlane.f32.xlu0 %v1148_v26  ;;  %v1151_v28 = vmax.f32 %v3509_v24, %v3513_v27 }
 0x429   : > { %1152 = vmax.xlane.f32.xlu1 %v1151_v28 }
 0x42b   : > { %v3517_v29 = vpop.f32.mrb[28].mxu1 }
 0x42c   : > { %v3519_v30 = vpop.f32.mrb[29].mxu1 }
 0x42d   : > { %v3521_v31 = vpop.f32.mrb[30].mxu1  ;;  %v1154_v32 = vmax.f32 %v3517_v29, %v3519_v30 }
 0x42e   : > { %v3525_v33 = vpop.f32.mrb[31].mxu1 }
 0x42f   : > { %1155 = vmax.xlane.f32.xlu0 %v1154_v32  ;;  %v1157_v34 = vmax.f32 %v3521_v31, %v3525_v33 }
 0x431   : > { %1158 = vmax.xlane.f32.xlu1 %v1157_v34 }
 0x484   : > { %v1114_v3 = vpop.xlane.xlu0 %1113 }
 0x485   : > { %v1160_v7 = vsub.f32 %v3433_v50, %v1114_v3  ;;  %v1161_v9 = vsub.f32 %v3435_v51, %v1114_v3 }
 0x487   : > { %v1192_v13 = vmul.f32 1.442695, %v1160_v7  ;;  %v1194_v15 = vmul.f32 1.442695, %v1161_v9 }
 0x488   : > { %v1117_v19 = vpop.xlane.xlu0 %1116 }
 0x489   : > { %2534 = vpow2.f32 %v1192_v13  ;;  %v1162_v21 = vsub.f32 %v3437_v52, %v1117_v19  ;;  %v1163_v26 = vsub.f32 %v3441_v54, %v1117_v19 }
 0x48a   : > { %2536 = vpow2.f32 %v1194_v15 }
 0x48b   : > { %v1196_v28 = vmul.f32 1.442695, %v1162_v21  ;;  %v1198_v32 = vmul.f32 1.442695, %v1163_v26 }
 0x48c   : > { %v1120_v34 = vpop.xlane.xlu1 %1119 }
 0x48d   : > { %2538 = vpow2.f32 %v1196_v28  ;;  %v1164_v35 = vsub.f32 %v3445_v56, %v1120_v34  ;;  %v1165_v36 = vsub.f32 %v3447_v57, %v1120_v34  ;;  %v1393_v28 = vld [vmem:[%s3299_s8 + $0x38] sm:$0xff] }
 0x48e   : > { %2540 = vpow2.f32 %v1198_v32 }
 0x48f   : > { %v1200_v50 = vmul.f32 1.442695, %v1164_v35  ;;  %v1202_v51 = vmul.f32 1.442695, %v1165_v36 }
 0x490   : > { %v1123_v37 = vpop.xlane.xlu1 %1122 }
 0x491   : > { %2542 = vpow2.f32 %v1200_v50  ;;  %v1166_v38 = vsub.f32 %v3449_v58, %v1123_v37  ;;  %v1167_v52 = vsub.f32 %v3453_v60, %v1123_v37 }
 0x492   : > { %2544 = vpow2.f32 %v1202_v51 }
 0x493   : > { %v3551_v54 = vpop.eup %2534  ;;  %v1204_v39 = vmul.f32 1.442695, %v1166_v38  ;;  %v1206_v40 = vmul.f32 1.442695, %v1167_v52 }
 0x494   : > { %v3553_v41 = vpop.eup %2536  ;;  %v1126_v42 = vpop.xlane.xlu0 %1125 }
 0x495   : > { %2546 = vpow2.f32 %v1204_v39  ;;  %v1168_v56 = vsub.f32 %v3457_v62, %v1126_v42  ;;  %v1169_v57 = vsub.f32 %v3459_v63, %v1126_v42  ;;  %v1256_v43 = vadd.f32 %v3553_v41, %v3551_v54  ;;  %v1411_v42 = vld [vmem:[%s3299_s8 + $0xc8] sm:$0xff] }
 0x496   : > { %2548 = vpow2.f32 %v1206_v40  ;;  %v1129_v58 = vpop.xlane.xlu1 %1128 }
 0x497   : > { %v3559_v44 = vpop.eup %2538  ;;  %v1208_v60 = vmul.f32 1.442695, %v1168_v56  ;;  %v1210_v45 = vmul.f32 1.442695, %v1169_v57  ;;  %v1170_v25 = vsub.f32 %v3461_v0, %v1129_v58  ;;  %v1171_v46 = vsub.f32 %v3465_v2, %v1129_v58  ;;  %1257 = vadd.xlane.f32.xlu0 %v1256_v43  ;;  %v1394_v57 = vld [vmem:[%s3299_s8 + $0x40] sm:$0xff]  ;;  %v1395_v43 = vld [vmem:[%s3299_s8 + $0x48] sm:$0xff] }
 0x498   : > { %v3563_v47 = vpop.eup %2540 }
 0x499   : > { %2550 = vpow2.f32 %v1208_v60  ;;  %v1212_v62 = vmul.f32 1.442695, %v1170_v25  ;;  %v1214_v48 = vmul.f32 1.442695, %v1171_v46  ;;  %v1259_v63 = vadd.f32 %v3563_v47, %v3559_v44  ;;  %v1413_v25 = vld [vmem:[%s3299_s8 + $0xd8] sm:$0xff] }
 0x49a   : > { %2552 = vpow2.f32 %v1210_v45  ;;  %v1412_v45 = vld [vmem:[%s3299_s8 + $0xd0] sm:$0xff] }
 0x49b   : > { %v3567_v49 = vpop.eup %2542  ;;  %2554 = vpow2.f32 %v1212_v62  ;;  %1260 = vadd.xlane.f32.xlu1 %v1259_v63  ;;  %v1396_v63 = vld [vmem:[%s3299_s8 + $0x50] sm:$0xff] }
 0x49c   : > { %v3569_v53 = vpop.eup %2544  ;;  %2556 = vpow2.f32 %v1214_v48  ;;  %v1132_v0 = vpop.xlane.xlu0 %1131  ;;  %v1431_v48 = vpack.c.bf16 %v1413_v25, %v1412_v45 }
 0x49d   : > { %v1172_v2 = vsub.f32 %v3469_v4, %v1132_v0  ;;  %v1173_v55 = vsub.f32 %v3471_v5, %v1132_v0  ;;  %v1262_v59 = vadd.f32 %v3569_v53, %v3567_v49  ;;  %v1397_v0 = vld [vmem:[%s3299_s8 + $0x58] sm:$0xff] }
 0x49e   : > { %v1135_v61 = vpop.xlane.xlu1 %1134 }
 0x49f   : > { %v3575_v1 = vpop.eup %2546  ;;  %v1216_v3 = vmul.f32 1.442695, %v1172_v2  ;;  %v1218_v7 = vmul.f32 1.442695, %v1173_v55  ;;  %v1174_v9 = vsub.f32 %v3473_v6, %v1135_v61  ;;  %v1175_v13 = vsub.f32 %v3477_v8, %v1135_v61  ;;  %1263 = vadd.xlane.f32.xlu0 %v1262_v59  ;;  %v1392_v8 = vld [vmem:[%s3299_s8 + $0x30] sm:$0xff] }
 0x4a0   : > { %v3579_v15 = vpop.eup %2548  ;;  %v1421_v50 = vpack.c.bf16 %v1393_v28, %v1392_v8  ;;  %v1398_v28 = vld [vmem:[%s3299_s8 + $0x60] sm:$0xff] }
 0x4a1   : > { %2558 = vpow2.f32 %v1216_v3  ;;  %v1220_v4 = vmul.f32 1.442695, %v1174_v9  ;;  %v1222_v5 = vmul.f32 1.442695, %v1175_v13  ;;  %v1265_v19 = vadd.f32 %v3579_v15, %v3575_v1 }
 0x4a2   : > { %2560 = vpow2.f32 %v1218_v7  ;;  %2139 = vmatpush3.bf16.msra.mxu0 %v1421_v50  ;;  %v1423_v3 = vpack.c.bf16 %v1397_v0, %v1396_v63  ;;  %v1416_v50 = vld [vmem:[%s3299_s8 + $0xf0] sm:$0xff] }
 0x4a3   : > { %v3583_v21 = vpop.eup %2550  ;;  %2562 = vpow2.f32 %v1220_v4  ;;  %1266 = vadd.xlane.f32.xlu1 %v1265_v19 }
 0x4a4   : > { %v3585_v26 = vpop.eup %2552  ;;  %2564 = vpow2.f32 %v1222_v5  ;;  %v1138_v6 = vpop.xlane.xlu0 %1137 }
 0x4a5   : > { %v3589_v32 = vpop.eup %2554  ;;  %v1176_v34 = vsub.f32 %v3481_v10, %v1138_v6  ;;  %v1177_v35 = vsub.f32 %v3483_v11, %v1138_v6  ;;  %v1268_v36 = vadd.f32 %v3585_v26, %v3583_v21  ;;  %v1410_v10 = vld [vmem:[%s3299_s8 + $0xc0] sm:$0xff] }
 0x4a6   : > { %v3595_v51 = vpop.eup %2556  ;;  %v1141_v37 = vpop.xlane.xlu1 %1140  ;;  %v1430_v56 = vpack.c.bf16 %v1411_v42, %v1410_v10  ;;  %v1401_v10 = vld [vmem:[%s3299_s8 + $0x78] sm:$0xff] }
 0x4a7   : > { %v1224_v38 = vmul.f32 1.442695, %v1176_v34  ;;  %v1226_v52 = vmul.f32 1.442695, %v1177_v35  ;;  %v1178_v39 = vsub.f32 %v3485_v12, %v1141_v37  ;;  %v1179_v40 = vsub.f32 %v3489_v14, %v1141_v37  ;;  %1269 = vadd.xlane.f32.xlu0 %v1268_v36  ;;  %v1399_v34 = vld [vmem:[%s3299_s8 + $0x68] sm:$0xff]  ;;  %v1417_v37 = vld [vmem:[%s3299_s8 + $0xf8] sm:$0xff] }
 0x4a8   : > { %v1271_v11 = vadd.f32 %v3595_v51, %v3589_v32  ;;  %v1422_v12 = vpack.c.bf16 %v1395_v43, %v1394_v57  ;;  %2140 = vmatprep.subr.bf16.mxu0 %v1430_v56 }
 0x4a9   : > { %2566 = vpow2.f32 %v1224_v38  ;;  %v1228_v58 = vmul.f32 1.442695, %v1178_v39  ;;  %v1230_v60 = vmul.f32 1.442695, %v1179_v40  ;;  %v1433_v39 = vpack.c.bf16 %v1417_v37, %v1416_v50  ;;  %v1400_v40 = vld [vmem:[%s3299_s8 + $0x70] sm:$0xff] }
 0x4aa   : > { %2568 = vpow2.f32 %v1226_v52  ;;  %1272 = vadd.xlane.f32.xlu1 %v1271_v11  ;;  %2141 = vmatpush3.bf16.msra.mxu0 %v1422_v12  ;;  %v1425_v43 = vpack.c.bf16 %v1401_v10, %v1400_v40 }
 0x4ab   : > { %v3605_v14 = vpop.eup %2558  ;;  %2570 = vpow2.f32 %v1228_v58  ;;  %2142 = vmatprep.subr.bf16.mxu0 %v1431_v48 }
 0x4ac   : > { %v3609_v46 = vpop.eup %2560  ;;  %2572 = vpow2.f32 %v1230_v60  ;;  %v1144_v62 = vpop.xlane.xlu0 %1143 }
 0x4ad   : > { %v3613_v2 = vpop.eup %2562  ;;  %v1180_v55 = vsub.f32 %v3493_v16, %v1144_v62  ;;  %v1181_v59 = vsub.f32 %v3495_v17, %v1144_v62  ;;  %v1274_v61 = vadd.f32 %v3609_v46, %v3605_v14  ;;  %v1414_v16 = vld [vmem:[%s3299_s8 + $0xe0] sm:$0xff]  ;;  %v1415_v17 = vld [vmem:[%s3299_s8 + $0xe8] sm:$0xff]  ;;  %s2955_s8 = smov [#allocation11]  }
 0x4ae   : > { %v3619_v7 = vpop.eup %2564  ;;  %v1147_v9 = vpop.xlane.xlu1 %1146  ;;  %2143 = vmatpush3.bf16.msra.mxu0 %v1423_v3  ;;  %v1432_v8 = vpack.c.bf16 %v1415_v17, %v1414_v16  ;;  %s2812_s23 = sshll.u32 %s2955_s8, 4  ;;  %s2813_s23 = int_to_ptr.vmem [resolvable:$false] %s2812_s23 }
 0x4af   : > { %v1232_v13 = vmul.f32 1.442695, %v1180_v55  ;;  %v1234_v4 = vmul.f32 1.442695, %v1181_v59  ;;  %v1182_v5 = vsub.f32 %v3497_v18, %v1147_v9  ;;  %v1183_v19 = vsub.f32 %v3501_v20, %v1147_v9  ;;  %1275 = vadd.xlane.f32.xlu0 %v1274_v61  ;;  %p2815_p13 = scmp.lt.s32.totalorder %s3849_s24, %s2813_s23 }
 0x4b0   : > { %v1277_v6 = vadd.f32 %v3619_v7, %v3613_v2  ;;  %v1424_v18 = vpack.c.bf16 %v1399_v34, %v1398_v28  ;;  %2144 = vmatprep.subr.bf16.mxu0 %v1432_v8 }
 0x4b1   : > { %2574 = vpow2.f32 %v1232_v13  ;;  %v1236_v35 = vmul.f32 1.442695, %v1182_v5  ;;  %v1238_v36 = vmul.f32 1.442695, %v1183_v19 }
 0x4b2   : > { %2576 = vpow2.f32 %v1234_v4  ;;  %1278 = vadd.xlane.f32.xlu1 %v1277_v6  ;;  %2145 = vmatpush3.bf16.msra.mxu0 %v1424_v18 }
 0x4b3   : > { %v3629_v20 = vpop.eup %2566  ;;  %2578 = vpow2.f32 %v1236_v35  ;;  %2146 = vmatprep.subr.bf16.mxu0 %v1433_v39 }
 0x4b4   : > { %v3633_v38 = vpop.eup %2568  ;;  %2580 = vpow2.f32 %v1238_v36  ;;  %v1150_v52 = vpop.xlane.xlu0 %1149 }
 0x4b5   : > { %v3637_v42 = vpop.eup %2570  ;;  %v1184_v11 = vsub.f32 %v3505_v22, %v1150_v52  ;;  %v1185_v56 = vsub.f32 %v3507_v23, %v1150_v52  ;;  %v1280_v57 = vadd.f32 %v3633_v38, %v3629_v20  ;;  %v1540_v52 = vld [vmem:[#allocation2 + $0x80] sm:$0xff] }
 0x4b6   : > { %v3643_v58 = vpop.eup %2572  ;;  %v1153_v60 = vpop.xlane.xlu1 %1152  ;;  %2147 = vmatpush3.bf16.msra.mxu0 %v1425_v43 }
 0x4b7   : > { %v1240_v12 = vmul.f32 1.442695, %v1184_v11  ;;  %v1242_v45 = vmul.f32 1.442695, %v1185_v56  ;;  %v1186_v25 = vsub.f32 %v3509_v24, %v1153_v60  ;;  %v1187_v62 = vsub.f32 %v3513_v27, %v1153_v60  ;;  %1281 = vadd.xlane.f32.xlu0 %v1280_v57  ;;  %2308 = vmatprep.subr.bf16.mxu0 %v1540_v52 }
 0x4b8   : > { %v1283_v22 = vadd.f32 %v3643_v58, %v3637_v42 }
 0x4b9   : > { %2582 = vpow2.f32 %v1240_v12  ;;  %v1244_v23 = vmul.f32 1.442695, %v1186_v25  ;;  %v1246_v48 = vmul.f32 1.442695, %v1187_v62 }
 0x4ba   : > { %2584 = vpow2.f32 %v1242_v45  ;;  %1284 = vadd.xlane.f32.xlu1 %v1283_v22 }
 0x4bb   : > { %v3649_v63 = vpop.eup %2574  ;;  %2586 = vpow2.f32 %v1244_v23 }
 0x4bc   : > { %v3651_v0 = vpop.eup %2576  ;;  %2588 = vpow2.f32 %v1246_v48  ;;  %v1156_v55 = vpop.xlane.xlu0 %1155  ;;  %v1541_v48 = vld [vmem:[#allocation2 + $0x88] sm:$0xff] }
 0x4bd   : > { %v3653_v24 = vpop.eup %2578  ;;  %v1188_v27 = vsub.f32 %v3517_v29, %v1156_v55  ;;  %v1189_v59 = vsub.f32 %v3519_v30, %v1156_v55  ;;  %v1286_v61 = vadd.f32 %v3651_v0, %v3649_v63 }
 0x4be   : > { %v3659_v3 = vpop.eup %2580  ;;  %v1159_v9 = vpop.xlane.xlu1 %1158 }
 0x4bf   : > { %v1248_v13 = vmul.f32 1.442695, %v1188_v27  ;;  %v1250_v4 = vmul.f32 1.442695, %v1189_v59  ;;  %1287 = vadd.xlane.f32.xlu0 %v1286_v61  ;;  %v1190_v5 = vsub.f32 %v3521_v31, %v1159_v9  ;;  %v1191_v19 = vsub.f32 %v3525_v33, %v1159_v9  ;;  %v1542_v61 = vld [vmem:[#allocation2 + $0x90] sm:$0xff] }
 0x4c0   : > { %v1289_v16 = vadd.f32 %v3659_v3, %v3653_v24 }
 0x4c1   : > { %2590 = vpow2.f32 %v1248_v13  ;;  %v1252_v29 = vmul.f32 1.442695, %v1190_v5  ;;  %v1254_v17 = vmul.f32 1.442695, %v1191_v19  ;;  %v1543_v19 = vld [vmem:[#allocation2 + $0x98] sm:$0xff] }
 0x4c2   : > { %2592 = vpow2.f32 %v1250_v4  ;;  %1290 = vadd.xlane.f32.xlu1 %v1289_v16 }
 0x4c3   : > { %v3665_v30 = vpop.eup %2582  ;;  %2594 = vpow2.f32 %v1252_v29 }
 0x4c4   : > { %v3667_v6 = vpop.eup %2584  ;;  %2596 = vpow2.f32 %v1254_v17 }
 0x4c5   : > { %v3669_v8 = vpop.eup %2586  ;;  %v1292_v31 = vadd.f32 %v3667_v6, %v3665_v30 }
 0x4c6   : > { %v3673_v33 = vpop.eup %2588 }
 0x4c7   : > { %1293 = vadd.xlane.f32.xlu0 %v1292_v31  ;;  %v1295_v28 = vadd.f32 %v3673_v33, %v3669_v8 }
 0x4c9   : > { %1296 = vadd.xlane.f32.xlu1 %v1295_v28 }
 0x4cb   : > { %v3677_v34 = vpop.eup %2590 }
 0x4cc   : > { %v3679_v35 = vpop.eup %2592 }
 0x4cd   : > { %v3681_v36 = vpop.eup %2594  ;;  %v1298_v18 = vadd.f32 %v3679_v35, %v3677_v34 }
 0x4ce   : > { %v3685_v50 = vpop.eup %2596 }
 0x4cf   : > { %1299 = vadd.xlane.f32.xlu0 %v1298_v18  ;;  %v1301_v37 = vadd.f32 %v3685_v50, %v3681_v36 }
 0x4d1   : > { %1302 = vadd.xlane.f32.xlu1 %v1301_v37 }
 0x524   : > { %v1258_v39 = vpop.xlane.xlu0 %1257 }
 0x525   : > { %2598 = vrcp.f32 %v1258_v39 }
 0x528   : > { %v1261_v40 = vpop.xlane.xlu1 %1260 }
 0x529   : > { %2600 = vrcp.f32 %v1261_v40 }
 0x52c   : > { %v1264_v10 = vpop.xlane.xlu0 %1263 }
 0x52d   : > { %2602 = vrcp.f32 %v1264_v10 }
 0x52f   : > { %v2599_v56 = vpop.eup %2598 }
 0x530   : > { %v1267_v11 = vpop.xlane.xlu1 %1266  ;;  %v1320_v43 = vmul.f32 %v2599_v56, %v3551_v54  ;;  %v1321_v45 = vmul.f32 %v2599_v56, %v3553_v41 }
 0x531   : > { %2604 = vrcp.f32 %v1267_v11 }
 0x533   : > { %v2601_v57 = vpop.eup %2600 }
 0x534   : > { %v1322_v60 = vmul.f32 %v2601_v57, %v3559_v44  ;;  %v1270_v12 = vpop.xlane.xlu0 %1269  ;;  %v1323_v25 = vmul.f32 %v2601_v57, %v3563_v47 }
 0x535   : > { %2606 = vrcp.f32 %v1270_v12 }
 0x536   : > { %v1353_v62 = vpack.c.bf16 %v1323_v25, %v1321_v45  ;;  %v1352_v22 = vpack.c.bf16 %v1322_v60, %v1320_v43 }
 0x537   : > { %v1273_v23 = vpop.xlane.xlu1 %1272  ;;  %v2603_v55 = vpop.eup %2602 }
 0x538   : > { %2608 = vrcp.f32 %v1273_v23  ;;  %1466 = vmatprep.mubr.bf16.mxu0 %v1353_v62  ;;  %v1325_v44 = vmul.f32 %v2603_v55, %v3569_v53  ;;  %v1324_v41 = vmul.f32 %v2603_v55, %v3567_v49 }
 0x539   : > { %1467 = vmatmul.mubr.bf16.vlgmr.msra.gmra.mrb[16].mxu0 %v1352_v22 }
 0x53a   : > { %2309 = vmatpush3.bf16.msra.mxu0 %v1540_v52 }
 0x53b   : > { %v2605_v27 = vpop.eup %2604  ;;  %2310 = vmatprep.subr.bf16.mxu0 %v1541_v48 }
 0x53c   : > { %v1276_v54 = vpop.xlane.xlu0 %1275  ;;  %v1327_v59 = vmul.f32 %v2605_v27, %v3579_v15  ;;  %v1326_v47 = vmul.f32 %v2605_v27, %v3575_v1 }
 0x53d   : > { %2610 = vrcp.f32 %v1276_v54 }
 0x53e   : > { %v1355_v9 = vpack.c.bf16 %v1327_v59, %v1325_v44  ;;  %v1354_v13 = vpack.c.bf16 %v1326_v47, %v1324_v41  ;;  %2311 = vmatpush3.bf16.msra.mxu0 %v1541_v48 }
 0x53f   : > { %v1279_v4 = vpop.xlane.xlu1 %1278  ;;  %2312 = vmatprep.subr.bf16.mxu0 %v1542_v61  ;;  %v2607_v5 = vpop.eup %2606 }
 0x540   : > { %2612 = vrcp.f32 %v1279_v4  ;;  %1474 = vmatprep.mubr.bf16.mxu0 %v1355_v9  ;;  %v1329_v53 = vmul.f32 %v2607_v5, %v3585_v26  ;;  %v1328_v17 = vmul.f32 %v2607_v5, %v3583_v21  ;;  %v1546_v4 = vld [vmem:[#allocation2 + $0xb0] sm:$0xff]  ;;  %v1680_v5 = vld [vmem:[#allocation2 + $0xd8] sm:$0xff] }
 0x541   : > { %1475 = vmatmul.mubr.bf16.gmra.mrb[20].mxu0 %v1354_v13 }
 0x542   : > { %v2609_v16 = vpop.eup %2608  ;;  %2313 = vmatpush3.bf16.msra.mxu0 %v1542_v61 }
 0x543   : > { %v1331_v49 = vmul.f32 %v2609_v16, %v3595_v51  ;;  %v1330_v1 = vmul.f32 %v2609_v16, %v3589_v32  ;;  %2314 = vmatprep.subr.bf16.mxu0 %v1543_v19  ;;  %v1682_v16 = vld [vmem:[#allocation2 + $0xe8] sm:$0xff] }
 0x544   : > { %v1282_v15 = vpop.xlane.xlu0 %1281 }
 0x545   : > { %v1357_v29 = vpack.c.bf16 %v1331_v49, %v1329_v53  ;;  %2614 = vrcp.f32 %v1282_v15  ;;  %v1356_v28 = vpack.c.bf16 %v1330_v1, %v1328_v17  ;;  %v1371_v17 = vld [vmem:[%s3723_s10 + $0x8] sm:$0xff] }
 0x546   : > { %2315 = vmatpush3.bf16.msra.mxu0 %v1543_v19  ;;  %v1681_v19 = vld [vmem:[#allocation2 + $0xe0] sm:$0xff] }
 0x547   : > { %1482 = vmatprep.mubr.bf16.mxu0 %v1357_v29  ;;  %v1285_v31 = vpop.xlane.xlu1 %1284  ;;  %v2611_v18 = vpop.eup %2610  ;;  %v1370_v29 = vld [vmem:[%s3723_s10] sm:$0xff] }
 0x548   : > { %2616 = vrcp.f32 %v1285_v31  ;;  %v1333_v26 = vmul.f32 %v2611_v18, %v3609_v46  ;;  %v1332_v40 = vmul.f32 %v2611_v18, %v3605_v14 }
 0x549   : > { %1483 = vmatmul.mubr.bf16.gmra.mrb[24].mxu0 %v1356_v28 }
 0x54a   : > { %v2613_v37 = vpop.eup %2612 }
 0x54b   : > { %v1335_v51 = vmul.f32 %v2613_v37, %v3619_v7  ;;  %v1334_v32 = vmul.f32 %v2613_v37, %v3613_v2 }
 0x54c   : > { %v1288_v52 = vpop.xlane.xlu0 %1287 }
 0x54d   : > { %v1359_v39 = vpack.c.bf16 %v1335_v51, %v1333_v26  ;;  %2618 = vrcp.f32 %v1288_v52  ;;  %v1358_v10 = vpack.c.bf16 %v1334_v32, %v1332_v40  ;;  %v1372_v40 = vld [vmem:[%s3723_s10 + $0x10] sm:$0xff] }
 0x54f   : > { %1490 = vmatprep.mubr.bf16.mxu0 %v1359_v39  ;;  %v1291_v21 = vpop.xlane.xlu1 %1290  ;;  %v2615_v11 = vpop.eup %2614 }
 0x550   : > { %2620 = vrcp.f32 %v1291_v21  ;;  %v1337_v57 = vmul.f32 %v2615_v11, %v3633_v38  ;;  %v1336_v60 = vmul.f32 %v2615_v11, %v3629_v20  ;;  %v1373_v21 = vld [vmem:[%s3723_s10 + $0x18] sm:$0xff] }
 0x551   : > { %1491 = vmatmul.mubr.bf16.gmra.mrb[28].mxu0 %v1358_v10 }
 0x552   : > { %v2617_v56 = vpop.eup %2616 }
 0x553   : > { %v1339_v46 = vmul.f32 %v2617_v56, %v3643_v58  ;;  %v1338_v7 = vmul.f32 %v2617_v56, %v3637_v42 }
 0x554   : > { %v1294_v43 = vpop.xlane.xlu0 %1293 }
 0x555   : > { %2622 = vrcp.f32 %v1294_v43  ;;  %v1361_v2 = vpack.c.bf16 %v1339_v46, %v1337_v57  ;;  %v1360_v12 = vpack.c.bf16 %v1338_v7, %v1336_v60 }
 0x556   : > { %v1297_v14 = vpop.xlane.xlu1 %1296 }
 0x557   : > { %1498 = vmatprep.mubr.bf16.mxu0 %v1361_v2  ;;  %2624 = vrcp.f32 %v1297_v14  ;;  %v2619_v45 = vpop.eup %2618  ;;  %v1374_v14 = vld [vmem:[%s3723_s10 + $0x20] sm:$0xff] }
 0x558   : > { %v1341_v62 = vmul.f32 %v2619_v45, %v3651_v0  ;;  %v1340_v23 = vmul.f32 %v2619_v45, %v3649_v63 }
 0x559   : > { %1499 = vmatmul.mubr.bf16.gmra.mrb[32].mxu0 %v1360_v12  ;;  %v1375_v12 = vld [vmem:[%s3723_s10 + $0x28] sm:$0xff] }
 0x55a   : > { %v2621_v25 = vpop.eup %2620 }
 0x55b   : > { %v1343_v38 = vmul.f32 %v2621_v25, %v3659_v3  ;;  %v1342_v58 = vmul.f32 %v2621_v25, %v3653_v24 }
 0x55c   : > { %v1300_v22 = vpop.xlane.xlu0 %1299 }
 0x55d   : > { %2626 = vrcp.f32 %v1300_v22  ;;  %v1363_v42 = vpack.c.bf16 %v1343_v38, %v1341_v62  ;;  %v1362_v55 = vpack.c.bf16 %v1342_v58, %v1340_v23 }
 0x55e   : > { %v1303_v48 = vpop.xlane.xlu1 %1302 }
 0x55f   : > { %v2623_v20 = vpop.eup %2622  ;;  %1506 = vmatprep.mubr.bf16.mxu0 %v1363_v42  ;;  %2628 = vrcp.f32 %v1303_v48 }
 0x560   : > { %v1345_v54 = vmul.f32 %v2623_v20, %v3667_v6  ;;  %v1344_v24 = vmul.f32 %v2623_v20, %v3665_v30  ;;  %v1545_v30 = vld [vmem:[#allocation2 + $0xa8] sm:$0xff]  ;;  %v1376_v20 = vld [vmem:[%s3723_s10 + $0x30] sm:$0xff] }
 0x561   : > { %v2625_v27 = vpop.eup %2624  ;;  %1507 = vmatmul.mubr.bf16.gmra.mrb[36].mxu0 %v1362_v55  ;;  %v1377_v55 = vld [vmem:[%s3723_s10 + $0x38] sm:$0xff] }
 0x562   : > { %v1347_v0 = vmul.f32 %v2625_v27, %v3673_v33  ;;  %v1346_v3 = vmul.f32 %v2625_v27, %v3669_v8  ;;  %v1544_v8 = vld [vmem:[#allocation2 + $0xa0] sm:$0xff] }
 0x563   : > { %2316 = vmatprep.subr.bf16.mxu0 %v1544_v8 }
 0x564   : > { %v1365_v44 = vpack.c.bf16 %v1347_v0, %v1345_v54  ;;  %v1364_v41 = vpack.c.bf16 %v1346_v3, %v1344_v24  ;;  %2317 = vmatpush3.bf16.msra.mxu0 %v1544_v8 }
 0x565   : > { %2318 = vmatprep.subr.bf16.mxu0 %v1545_v30 }
 0x566   : > { %1514 = vmatprep.mubr.bf16.mxu0 %v1365_v44 }
 0x567   : > { %v2627_v59 = vpop.eup %2626 }
 0x568   : > { %v1349_v47 = vmul.f32 %v2627_v59, %v3679_v35  ;;  %v1348_v6 = vmul.f32 %v2627_v59, %v3677_v34  ;;  %2319 = vmatpush3.bf16.msra.mxu0 %v1545_v30  ;;  %v1547_v35 = vld [vmem:[#allocation2 + $0xb8] sm:$0xff]  ;;  %v1679_v34 = vld [vmem:[#allocation2 + $0xd0] sm:$0xff] }
 0x569   : > { %v2629_v63 = vpop.eup %2628  ;;  %1515 = vmatmul.mubr.bf16.gmra.mrb[40].mxu0 %v1364_v41  ;;  %2320 = vmatprep.subr.bf16.mxu0 %v1546_v4 }
 0x56a   : > { %v1351_v61 = vmul.f32 %v2629_v63, %v3685_v50  ;;  %v1350_v9 = vmul.f32 %v2629_v63, %v3681_v36  ;;  %v1677_v50 = vld [vmem:[#allocation2 + $0xc0] sm:$0xff]  ;;  %v1678_v36 = vld [vmem:[#allocation2 + $0xc8] sm:$0xff] }
 0x56b   : > { %2340 = vmatprep.subr.bf16.mxu1 %v1677_v50 }
 0x56c   : > { %v1367_v13 = vpack.c.bf16 %v1351_v61, %v1349_v47  ;;  %v1366_v33 = vpack.c.bf16 %v1350_v9, %v1348_v6  ;;  %2321 = vmatpush3.bf16.msra.mxu0 %v1546_v4  ;;  %2341 = vmatpush3.bf16.msra.mxu1 %v1677_v50  ;;  %v1378_v47 = vld [vmem:[%s3723_s10 + $0x40] sm:$0xff]  ;;  %v1379_v61 = vld [vmem:[%s3723_s10 + $0x48] sm:$0xff] }
 0x56d   : > { %2322 = vmatprep.subr.bf16.mxu0 %v1547_v35  ;;  %2342 = vmatprep.subr.bf16.mxu1 %v1678_v36 }
 0x56e   : > { %1522 = vmatprep.mubr.bf16.mxu0 %v1367_v13 }
 0x570   : > { %2323 = vmatpush3.bf16.msra.mxu0 %v1547_v35  ;;  %2343 = vmatpush3.bf16.msra.mxu1 %v1678_v36  ;;  %v1380_v36 = vld [vmem:[%s3723_s10 + $0x50] sm:$0xff] }
 0x571   : > { %1523 = vmatmul.mubr.bf16.gmra.mrb[44].mxu0 %v1366_v33  ;;  %2344 = vmatprep.subr.bf16.mxu1 %v1679_v34 }
 0x574   : > { %2345 = vmatpush3.bf16.msra.mxu1 %v1679_v34  ;;  %v1381_v34 = vld [vmem:[%s3723_s10 + $0x58] sm:$0xff] }
 0x575   : > { %2346 = vmatprep.subr.bf16.mxu1 %v1680_v5 }
 0x578   : > { %2347 = vmatpush3.bf16.msra.mxu1 %v1680_v5 }
 0x579   : > { %2348 = vmatprep.subr.bf16.mxu1 %v1681_v19 }
 0x57c   : > { %2349 = vmatpush3.bf16.msra.mxu1 %v1681_v19 }
 0x57d   : > { %2350 = vmatprep.subr.bf16.mxu1 %v1682_v16 }
 0x580   : > { %2351 = vmatpush3.bf16.msra.mxu1 %v1682_v16 }
 0x60c   : > { %v2148_v53 = vpop.f32.mrb[16].mxu0 }
 0x60d   : > { %v2149_v49 = vpop.f32.mrb[17].mxu0 }
 0x60e   : > { %v2150_v1 = vadd.f32 %v2149_v49, %v2148_v53  ;;  %v2151_v15 = vpop.f32.mrb[18].mxu0 }
 0x60f   : > { %v2152_v31 = vpop.f32.mrb[19].mxu0 }
 0x610   : > { %v2153_v28 = vadd.f32 %v2152_v31, %v2151_v15  ;;  %v3727_v18 = vadd.f32 %v2150_v1, %v1370_v29  ;;  %v1382_v31 = vld [vmem:[%s3723_s10 + $0x60] sm:$0xff] }
 0x612   : > { %v3729_v37 = vadd.f32 %v2153_v28, %v1371_v17  ;;  %v1383_v28 = vld [vmem:[%s3723_s10 + $0x68] sm:$0xff] }
 0x614   : > { %v2154_v26 = vpop.f32.mrb[20].mxu0  ;;  %v1531_v51 = vpack.c.bf16 %v3729_v37, %v3727_v18 }
 0x615   : > { %v2155_v32 = vpop.f32.mrb[21].mxu0 }
 0x616   : > { %v2156_v52 = vadd.f32 %v2155_v32, %v2154_v26  ;;  %v2157_v39 = vpop.f32.mrb[22].mxu0  ;;  %2324 = vmatprep.mubr.bf16.mxu0 %v1531_v51 }
 0x617   : > { %v2158_v10 = vpop.f32.mrb[23].mxu0 }
 0x618   : > { %v2159_v11 = vadd.f32 %v2158_v10, %v2157_v39  ;;  %v3735_v56 = vadd.f32 %v2156_v52, %v1372_v40 }
 0x61a   : > { %v3737_v57 = vadd.f32 %v2159_v11, %v1373_v21 }
 0x61c   : > { %v1532_v46 = vpack.c.bf16 %v3737_v57, %v3735_v56  ;;  %v2160_v7 = vpop.f32.mrb[24].mxu0 }
 0x61d   : > { %v2161_v43 = vpop.f32.mrb[25].mxu0 }
 0x61e   : > { %v2162_v2 = vadd.f32 %v2161_v43, %v2160_v7  ;;  %v2163_v60 = vpop.f32.mrb[26].mxu0  ;;  %2325 = vmatmul.mubr.bf16.vlgmr.msra.gmra.mrb[48].mxu0 %v1532_v46  ;;  %v1384_v46 = vld [vmem:[%s3723_s10 + $0x70] sm:$0xff]  ;;  %v1385_v7 = vld [vmem:[%s3723_s10 + $0x78] sm:$0xff]  ;;  %s2808_s10 = scalar_lea.vmem %s3849_s24, 2048 }
 0x61f   : > { %v2164_v45 = vpop.f32.mrb[27].mxu0  ;;  %p2809_p9 = scmp.ne.s32.totalorder %s3849_s24, %s2808_s10 }
 0x620   : > { %v2165_v25 = vadd.f32 %v2164_v45, %v2163_v60  ;;  %v3743_v62 = vadd.f32 %v2162_v2, %v1374_v14  ;;  %v1683_v45 = vld [vmem:[#allocation2 + $0xf0] sm:$0xff] }
 0x621   : > { %2352 = vmatprep.subr.bf16.mxu1 %v1683_v45  ;;  %p2810_p4 = pnand %p2809_p9, %p4020_p6 }
 0x622   : > { %v3745_v38 = vadd.f32 %v2165_v25, %v1375_v12  ;;  %2353 = vmatpush3.bf16.msra.mxu1 %v1683_v45  ;;  %v1684_v25 = vld [vmem:[#allocation2 + $0xf8] sm:$0xff] }
 0x623   : > { %2354 = vmatprep.subr.bf16.mxu1 %v1684_v25  ;;  %p2811_p3 = pneg %p2810_p4 }
 0x624   : > { %v2166_v58 = vpop.f32.mrb[28].mxu0  ;;  %v1533_v22 = vpack.c.bf16 %v3745_v38, %v3743_v62 }
 0x625   : > { %v2167_v42 = vpop.f32.mrb[29].mxu0 }
 0x626   : > { %v2168_v23 = vadd.f32 %v2167_v42, %v2166_v58  ;;  %v2169_v48 = vpop.f32.mrb[30].mxu0  ;;  %2328 = vmatprep.mubr.bf16.mxu0 %v1533_v22  ;;  %2355 = vmatpush3.bf16.msra.mxu1 %v1684_v25  ;;  %v2046_v58 = vld [vmem:[%s4015_s26] ss:$0 sm:$0xff]  ;;  %s2814_s26 = scalar_lea.vmem %s2813_s23, 4096 }
 0x627   : > { %v2170_v27 = vpop.f32.mrb[31].mxu0  ;;  %p2816_p0 = scmp.lt.s32.totalorder %s2814_s26, %s2808_s10 }
 0x628   : > { %v2171_v54 = vadd.f32 %v2170_v27, %v2169_v48  ;;  %v3751_v0 = vadd.f32 %v2168_v23, %v1376_v20 }
 0x629   : > { %p2817_p8 = por %p2816_p0, %p2815_p13 }
 0x62a   : > { %v3753_v3 = vadd.f32 %v2171_v54, %v1377_v55 }
 0x62b   : > { %p2818_p12 = pnand %p2817_p8, %p2811_p3 }
 0x62c   : > { %v2172_v44 = vpop.f32.mrb[32].mxu0  ;;  %v1534_v24 = vpack.c.bf16 %v3753_v3, %v3751_v0 }
 0x62d   : > { %v2173_v59 = vpop.f32.mrb[33].mxu0 }
 0x62e   : > { %v2174_v41 = vadd.f32 %v2173_v59, %v2172_v44  ;;  %v2175_v63 = vpop.f32.mrb[34].mxu0  ;;  %2329 = vmatmul.mubr.bf16.gmra.mrb[52].mxu0 %v1534_v24 }
 0x62f   : > { %v2176_v9 = vpop.f32.mrb[35].mxu0 }
 0x630   : > { %v2177_v13 = vadd.f32 %v2176_v9, %v2175_v63  ;;  %v3759_v6 = vadd.f32 %v2174_v41, %v1378_v47 }
 0x632   : > { %v3761_v33 = vadd.f32 %v2177_v13, %v1379_v61 }
 0x634   : > { %v2178_v8 = vpop.f32.mrb[36].mxu0  ;;  %v1535_v30 = vpack.c.bf16 %v3761_v33, %v3759_v6 }
 0x635   : > { %v2179_v4 = vpop.f32.mrb[37].mxu0 }
 0x636   : > { %v2180_v35 = vadd.f32 %v2179_v4, %v2178_v8  ;;  %v2181_v50 = vpop.f32.mrb[38].mxu0  ;;  %2332 = vmatprep.mubr.bf16.mxu0 %v1535_v30 }
 0x637   : > { %v2182_v5 = vpop.f32.mrb[39].mxu0 }
 0x638   : > { %v2183_v19 = vadd.f32 %v2182_v5, %v2181_v50  ;;  %v3767_v16 = vadd.f32 %v2180_v35, %v1380_v36 }
 0x63a   : > { %v3769_v53 = vadd.f32 %v2183_v19, %v1381_v34 }
 0x63c   : > { %v2184_v49 = vpop.f32.mrb[40].mxu0  ;;  %v1536_v1 = vpack.c.bf16 %v3769_v53, %v3767_v16 }
 0x63d   : > { %v2185_v15 = vpop.f32.mrb[41].mxu0 }
 0x63e   : > { %v2186_v29 = vadd.f32 %v2185_v15, %v2184_v49  ;;  %v2187_v17 = vpop.f32.mrb[42].mxu0  ;;  %2333 = vmatmul.mubr.bf16.gmra.mrb[56].mxu0 %v1536_v1 }
 0x63f   : > { %v2188_v26 = vpop.f32.mrb[43].mxu0 }
 0x640   : > { %v2189_v51 = vadd.f32 %v2188_v26, %v2187_v17  ;;  %v3775_v32 = vadd.f32 %v2186_v29, %v1382_v31 }
 0x642   : > { %v3777_v52 = vadd.f32 %v2189_v51, %v1383_v28 }
 0x644   : > { %v2190_v39 = vpop.f32.mrb[44].mxu0  ;;  %v1537_v40 = vpack.c.bf16 %v3777_v52, %v3775_v32 }
 0x645   : > { %v2191_v21 = vpop.f32.mrb[45].mxu0 }
 0x646   : > { %v2192_v10 = vadd.f32 %v2191_v21, %v2190_v39  ;;  %v2193_v11 = vpop.f32.mrb[46].mxu0  ;;  %2336 = vmatprep.mubr.bf16.mxu0 %v1537_v40 }
 0x647   : > { %v2194_v43 = vpop.f32.mrb[47].mxu0 }
 0x648   : > { %v2195_v2 = vadd.f32 %v2194_v43, %v2193_v11  ;;  %v3783_v60 = vadd.f32 %v2192_v10, %v1384_v46 }
 0x64a   : > { %v3785_v14 = vadd.f32 %v2195_v2, %v1385_v7 }
 0x64c   : > { %v1538_v12 = vpack.c.bf16 %v3785_v14, %v3783_v60 }
 0x64e   : > { %2337 = vmatmul.mubr.bf16.gmra.mrb[60].mxu0 %v1538_v12 }
 0x6f1   : > { %v2326_v22 = vpop.f32.mrb[48].mxu0 }
 0x6f2   : > { %v1598_v42 = vadd.f32 %v2326_v22, %v2046_v58  ;;  %v1589_v23 = vpop.f32.mrb[49].mxu0 }
 0x6f3   : > { %v1590_v48 = vadd.f32 %v2046_v58, %v1589_v23  ;;  %v2327_v20 = vpop.f32.mrb[50].mxu0 }
 0x6f4   : > { %v1601_v55 = vadd.f32 %v2327_v20, %v2046_v58  ;;  %v1592_v27 = vpop.f32.mrb[51].mxu0  ;;  %v1654_v44 = vmax.f32 %v1598_v42, 0.0 }
 0x6f5   : > { %v1593_v54 = vadd.f32 %v2046_v58, %v1592_v27  ;;  %v1652_v59 = vmax.f32 %v1590_v48, 0.0 }
 0x6f6   : > { %v1655_v24 = vmax.f32 %v1601_v55, 0.0 }
 0x6f7   : > { %v1653_v41 = vmax.f32 %v1593_v54, 0.0 }
 0x6f8   : > { %v1669_v63 = vpack.c.bf16 %v1655_v24, %v1654_v44  ;;  %v3795_v24 = vld [vmem:[%s4016_s12] ss:$0 sm:$0xff] }
 0x6f9   : > { %v1668_v47 = vpack.c.bf16 %v1653_v41, %v1652_v59 }
 0x6fb   : > { %2356 = vmatprep.mubr.bf16.mxu1 %v1668_v47 }
 0x6fc   : > { %2357 = vmatmul.mubr.bf16.vlgmr.msra.gmra.mrb[32].mxu1 %v1669_v63 }
 0x701   : > { %v2330_v61 = vpop.f32.mrb[52].mxu0 }
 0x702   : > { %v1614_v9 = vadd.f32 %v2330_v61, %v2046_v58  ;;  %v1605_v13 = vpop.f32.mrb[53].mxu0 }
 0x703   : > { %v1606_v8 = vadd.f32 %v2046_v58, %v1605_v13  ;;  %v2331_v30 = vpop.f32.mrb[54].mxu0 }
 0x704   : > { %v1617_v4 = vadd.f32 %v2331_v30, %v2046_v58  ;;  %v1608_v35 = vpop.f32.mrb[55].mxu0  ;;  %v1658_v36 = vmax.f32 %v1614_v9, 0.0 }
 0x705   : > { %v1609_v50 = vadd.f32 %v2046_v58, %v1608_v35  ;;  %v1656_v5 = vmax.f32 %v1606_v8, 0.0 }
 0x706   : > { %v1659_v34 = vmax.f32 %v1617_v4, 0.0 }
 0x707   : > { %v1657_v19 = vmax.f32 %v1609_v50, 0.0 }
 0x708   : > { %v1671_v49 = vpack.c.bf16 %v1659_v34, %v1658_v36 }
 0x709   : > { %v1670_v1 = vpack.c.bf16 %v1657_v19, %v1656_v5 }
 0x70b   : > { %2360 = vmatprep.mubr.bf16.mxu1 %v1670_v1 }
 0x70c   : > { %2361 = vmatmul.mubr.bf16.gmra.mrb[36].mxu1 %v1671_v49 }
 0x711   : > { %v2334_v15 = vpop.f32.mrb[56].mxu0 }
 0x712   : > { %v1630_v29 = vadd.f32 %v2334_v15, %v2046_v58  ;;  %v1621_v17 = vpop.f32.mrb[57].mxu0 }
 0x713   : > { %v1622_v31 = vadd.f32 %v2046_v58, %v1621_v17  ;;  %v2335_v28 = vpop.f32.mrb[58].mxu0 }
 0x714   : > { %v1633_v26 = vadd.f32 %v2335_v28, %v2046_v58  ;;  %v1624_v51 = vpop.f32.mrb[59].mxu0  ;;  %v1662_v40 = vmax.f32 %v1630_v29, 0.0 }
 0x715   : > { %v1625_v39 = vadd.f32 %v2046_v58, %v1624_v51  ;;  %v1660_v10 = vmax.f32 %v1622_v31, 0.0 }
 0x716   : > { %v1663_v21 = vmax.f32 %v1633_v26, 0.0 }
 0x717   : > { %v1661_v11 = vmax.f32 %v1625_v39, 0.0 }
 0x718   : > { %v1673_v46 = vpack.c.bf16 %v1663_v21, %v1662_v40 }
 0x719   : > { %v1672_v7 = vpack.c.bf16 %v1661_v11, %v1660_v10 }
 0x71b   : > { %2364 = vmatprep.mubr.bf16.mxu1 %v1672_v7 }
 0x71c   : > { %2365 = vmatmul.mubr.bf16.gmra.mrb[40].mxu1 %v1673_v46 }
 0x721   : > { %v2338_v43 = vpop.f32.mrb[60].mxu0 }
 0x722   : > { %v1646_v2 = vadd.f32 %v2338_v43, %v2046_v58  ;;  %v1637_v12 = vpop.f32.mrb[61].mxu0 }
 0x723   : > { %v1638_v45 = vadd.f32 %v2046_v58, %v1637_v12  ;;  %v2339_v25 = vpop.f32.mrb[62].mxu0 }
 0x724   : > { %v1649_v22 = vadd.f32 %v2339_v25, %v2046_v58  ;;  %v1640_v42 = vpop.f32.mrb[63].mxu0  ;;  %v1666_v48 = vmax.f32 %v1646_v2, 0.0 }
 0x725   : > { %v1641_v23 = vadd.f32 %v2046_v58, %v1640_v42  ;;  %v1664_v55 = vmax.f32 %v1638_v45, 0.0 }
 0x726   : > { %v1667_v20 = vmax.f32 %v1649_v22, 0.0 }
 0x727   : > { %v1665_v27 = vmax.f32 %v1641_v23, 0.0 }
 0x728   : > { %v1675_v54 = vpack.c.bf16 %v1667_v20, %v1666_v48 }
 0x729   : > { %v1674_v44 = vpack.c.bf16 %v1665_v27, %v1664_v55 }
 0x72b   : > { %2368 = vmatprep.mubr.bf16.mxu1 %v1674_v44 }
 0x72c   : > { %2369 = vmatmul.mubr.bf16.gmra.mrb[44].mxu1 %v1675_v54 }
 0x7cf   : > { %v2358_v59 = vpop.f32.mrb[32].mxu1 }
 0x7d0   : > { %v1735_v58 = vadd.f32 %v2358_v59, %v3795_v24  ;;  %v1726_v41 = vpop.f32.mrb[33].mxu1 }
 0x7d1   : > { %v1727_v63 = vadd.f32 %v3795_v24, %v1726_v41  ;;  %v2359_v47 = vpop.f32.mrb[34].mxu1 }
 0x7d2   : > { %v1791_v61 = vadd.f32 %v1735_v58, %v3735_v56  ;;  %v1738_v9 = vadd.f32 %v2359_v47, %v3795_v24  ;;  %v1729_v13 = vpop.f32.mrb[35].mxu1 }
 0x7d3   : > { %v1789_v8 = vadd.f32 %v1727_v63, %v3727_v18  ;;  %v1730_v30 = vadd.f32 %v3795_v24, %v1729_v13 }
 0x7d4   : > { %1807 = vst [vmem:[%s3301_s29 + $0x10] sm:$0xff] %v1791_v61  ;;  %v1792_v4 = vadd.f32 %v1738_v9, %v3737_v57 }
 0x7d5   : > { %1805 = vst [vmem:[%s3301_s29] sm:$0xff] %v1789_v8  ;;  %v1790_v35 = vadd.f32 %v1730_v30, %v3729_v37 }
 0x7d6   : > { %1808 = vst [vmem:[%s3301_s29 + $0x18] sm:$0xff] %v1792_v4 }
 0x7d7   : > { %1806 = vst [vmem:[%s3301_s29 + $0x8] sm:$0xff] %v1790_v35 }
 0x7df   : > { %v2362_v56 = vpop.f32.mrb[36].mxu1 }
 0x7e0   : > { %v1751_v50 = vadd.f32 %v2362_v56, %v3795_v24  ;;  %v1742_v36 = vpop.f32.mrb[37].mxu1 }
 0x7e1   : > { %v1743_v18 = vadd.f32 %v3795_v24, %v1742_v36  ;;  %v2363_v34 = vpop.f32.mrb[38].mxu1 }
 0x7e2   : > { %v1795_v5 = vadd.f32 %v1751_v50, %v3751_v0  ;;  %v1754_v19 = vadd.f32 %v2363_v34, %v3795_v24  ;;  %v1745_v57 = vpop.f32.mrb[39].mxu1 }
 0x7e3   : > { %v1793_v49 = vadd.f32 %v1743_v18, %v3743_v62  ;;  %v1746_v37 = vadd.f32 %v3795_v24, %v1745_v57 }
 0x7e4   : > { %1811 = vst [vmem:[%s3301_s29 + $0x30] sm:$0xff] %v1795_v5  ;;  %v1796_v1 = vadd.f32 %v1754_v19, %v3753_v3 }
 0x7e5   : > { %1809 = vst [vmem:[%s3301_s29 + $0x20] sm:$0xff] %v1793_v49  ;;  %v1794_v15 = vadd.f32 %v1746_v37, %v3745_v38 }
 0x7e6   : > { %1812 = vst [vmem:[%s3301_s29 + $0x38] sm:$0xff] %v1796_v1 }
 0x7e7   : > { %1810 = vst [vmem:[%s3301_s29 + $0x28] sm:$0xff] %v1794_v15 }
 0x7ef   : > { %v2366_v0 = vpop.f32.mrb[40].mxu1 }
 0x7f0   : > { %v1767_v29 = vadd.f32 %v2366_v0, %v3795_v24  ;;  %v1758_v62 = vpop.f32.mrb[41].mxu1 }
 0x7f1   : > { %v1759_v17 = vadd.f32 %v3795_v24, %v1758_v62  ;;  %v2367_v31 = vpop.f32.mrb[42].mxu1 }
 0x7f2   : > { %v1799_v28 = vadd.f32 %v1767_v29, %v3767_v16  ;;  %v1770_v3 = vadd.f32 %v2367_v31, %v3795_v24  ;;  %v1761_v26 = vpop.f32.mrb[43].mxu1 }
 0x7f3   : > { %v1797_v38 = vadd.f32 %v1759_v17, %v3759_v6  ;;  %v1762_v51 = vadd.f32 %v3795_v24, %v1761_v26 }
 0x7f4   : > { %1815 = vst [vmem:[%s3301_s29 + $0x50] sm:$0xff] %v1799_v28  ;;  %v1800_v39 = vadd.f32 %v1770_v3, %v3769_v53 }
 0x7f5   : > { %1813 = vst [vmem:[%s3301_s29 + $0x40] sm:$0xff] %v1797_v38  ;;  %v1798_v40 = vadd.f32 %v1762_v51, %v3761_v33 }
 0x7f6   : > { %1816 = vst [vmem:[%s3301_s29 + $0x58] sm:$0xff] %v1800_v39 }
 0x7f7   : > { %1814 = vst [vmem:[%s3301_s29 + $0x48] sm:$0xff] %v1798_v40 }
 0x7ff   : > { %v2370_v16 = vpop.f32.mrb[44].mxu1 }
 0x800   : > { %v1783_v21 = vadd.f32 %v2370_v16, %v3795_v24  ;;  %v1774_v6 = vpop.f32.mrb[45].mxu1 }
 0x801   : > { %v1775_v10 = vadd.f32 %v3795_v24, %v1774_v6  ;;  %v2371_v11 = vpop.f32.mrb[46].mxu1 }
 0x802   : > { %v1803_v33 = vadd.f32 %v1783_v21, %v3783_v60  ;;  %v1786_v53 = vadd.f32 %v2371_v11, %v3795_v24  ;;  %v1777_v46 = vpop.f32.mrb[47].mxu1 }
 0x803   : > { %v1801_v7 = vadd.f32 %v1775_v10, %v3775_v32  ;;  %v1778_v43 = vadd.f32 %v3795_v24, %v1777_v46 }
 0x804   : > { %1819 = vst [vmem:[%s3301_s29 + $0x70] sm:$0xff] %v1803_v33  ;;  %v1804_v2 = vadd.f32 %v1786_v53, %v3785_v14 }
 0x805   : > { %1817 = vst [vmem:[%s3301_s29 + $0x60] sm:$0xff] %v1801_v7  ;;  %v1802_v60 = vadd.f32 %v1778_v43, %v3777_v52 }
 0x806   : > { %1820 = vst [vmem:[%s3301_s29 + $0x78] sm:$0xff] %v1804_v2 }
 0x807   : > { %1818 = vst [vmem:[%s3301_s29 + $0x68] sm:$0xff] %v1802_v60 }
 0x808   : > { %2821 = shalt.err (!%p2818_p12)
}
 0x809   : > { %s2822_s29 = scalar_lea.hbm %s3847_s30, 2048  ;;  %s2826_s12 = scalar_lea.hbm %s4019_s9, 8192 }
 0x80a   : > { %p2823_p7 = scmp.ne.s32.totalorder %s3847_s30, %s2822_s29  ;;  %p2827_p1 = scmp.lt.u32.totalorder %s3847_s30, %s4019_s9 }
 0x80b   : > { %p2828_p10 = scmp.lt.u32.totalorder %s2826_s12, %s2822_s29  ;;  %p2830_p9 = scmp.lt.u32.totalorder %s2822_s29, %s3847_s30 }
 0x80c   : > { %p2824_p5 = pnand %p2823_p7, %p4020_p6 }
 0x80d   : > { %p2829_p2 = por %p2828_p10, %p2827_p1 }
 0x80e   : > { %p2825_p11 = pneg %p2824_p5 }
 0x80f   : > { %p2831_p4 = por %p2830_p9, %p2829_p2 }
 0x811   : > { %p2832_p3 = pnand %p2831_p4, %p2825_p11 }
 0x813   : > { %2835 = shalt.err (!%p2832_p3)
}
 0x814   : > { %s2956_s13 = smov 128   ;;  %s2957_s3 = smov 8  }
 0x815   : > { %2394 = dma.vmem_to_hbm [thread:$0]  (%p4020_p6), %s3849_s24, 2048, %s3847_s30, %s1822_s2, %s2956_s13, %s2956_s13, %s2957_s3  }
 0x816 PF: > { %s4021_s14 = sld [smem:[#allocation30_spill]]  ;;  %s4022_s7 = sld [smem:[#allocation39_spill]] }
 0x817   : > { %p2411_p13 = scmp.ge.s32.totalorder %s2942_s27, 2 }
 0x81c   : > { %s1852_s16 = sand.u32 1, %s4021_s14   ;;  %p4023_p0 = scmp.ne.s32.totalorder %s4022_s7, 0 }
 0x81d   : > { %s1853_s10 = scalar_lea.sflag [#allocation7], %s1852_s16 }
 0x81e   : > { %p2407_p8 = pnand %p2411_p13, %p4023_p0 }
 0x820   : > { %2897 = dma.done.wait (!%p2407_p8), %s1853_s10, 2048  }
 0x821   : > { %2899 = vsyncadd (!%p2407_p8), %s1853_s10, 4294965248  ;;  %s30_s27 = sadd.s32 1, %s2942_s27   ;;  %s4024_s17 = sld [smem:[#allocation29_spill]] }
 0x822   : > { %p27_p12 = scmp.ge.s32.totalorder %s30_s27, 6   ;;  %s4025_s24 = sld [smem:[#allocation33_spill]] }
 0x823   : > { %s4026_s4 = sld [smem:[#allocation36_spill]]  ;;  %s4027_s26 = sld [smem:[#allocation37_spill]] }
 0x824   : > { %s4028_s18 = smov %s2910_s19  ;;  %s4029_s19 = smov %s3191_s6 }
 0x825   : > { %s4030_s20 = smov %s2918_s21  ;;  %s4031_s21 = smov %s2922_s22 }
 0x826   : > { %s4032_s22 = smov %s3194_s5  ;;  %s4033_s23 = smov %s2934_s25 }
 0x827   :  { %29 = sbr.rel (!%p27_p12) target bundleno = 24 (0x18), region = 149 }
 0x829   : > { %s4034_s25 = smov %s4026_s4 }
 0x82e   :  { %1858 = vsyncpa [#allocation6], 1 }
 0x82f   :  { %1860 = vsyncpa [#allocation6 + $0x1], 1 }
 0x830   :  { %1861 = vsyncpa [#allocation9], 1 }
 0x831   :  { %1863 = vsyncpa [#allocation9 + $0x1], 1 }
 0x832   :  { %1864 = vsyncpa [#allocation7], 1 }
 0x833   :  { %1866 = vsyncpa [#allocation7 + $0x1], 1 }
 0x834   :  { %1867 = vsyncmov [#allocation3] }
 0x837   :  { %s1868_s6 = vpop.sfrf %1867 }
 0x838   :  { %p2054_p6 = scmp.ne.s32.totalorder %s1868_s6, 0 }
 0x83a   :  { %1872 = shalt.err (%p2054_p6)  }
 0x83b   :  { %1874 = vsyncmov [#allocation3 + $0x1] }
 0x83e   :  { %s1875_s5 = vpop.sfrf %1874 }
 0x83f   :  { %p2055_p7 = scmp.ne.s32.totalorder %s1875_s5, 0 }
 0x841   :  { %1879 = shalt.err (%p2055_p7)  }
 0x842   :  { %1881 = vsyncmov [#allocation3 + $0x2] }
 0x845   :  { %s1882_s30 = vpop.sfrf %1881 }
 0x846   :  { %p2056_p5 = scmp.ne.s32.totalorder %s1882_s30, 0 }
 0x848   :  { %1886 = shalt.err (%p2056_p5)  }
 0x849   :  { %1888 = vsyncmov [#allocation3 + $0x3] }
 0x84c   :  { %s1889_s27 = vpop.sfrf %1888 }
 0x84d   :  { %p2057_p11 = scmp.ne.s32.totalorder %s1889_s27, 0 }
 0x84f   :  { %1893 = shalt.err (%p2057_p11)  }

</bundles_post_ra>
